<compile_context>
chip_gen: v5e
topology: v5e:2x2
jax: 0.10.0
libtpu: 0.0.40
codegen_flags: <defaults>
</compile_context>

<pallas_src>
import functools

import numpy as np
import jax
import jax.numpy as jnp
from jax.experimental import pallas as pl
from jax.experimental.pallas import tpu as pltpu

ALPHA = 0.5  # matches CombinedLoss(alpha=0.5)


# ---------------------------------------------------------------------------
# Host-side glue: Ricker-CWT filter-bank (Toeplitz) matrix, shape [L, S*L].
# ---------------------------------------------------------------------------
def _ricker(points, a):
    A = 2.0 / (np.sqrt(3.0 * a) * np.pi ** 0.25)
    vec = np.arange(0, points) - (points - 1.0) / 2.0
    xsq = vec ** 2
    return A * (1.0 - xsq / a ** 2) * np.exp(-xsq / (2.0 * a ** 2))


def build_cwt_matrix(L, widths, dtype=jnp.bfloat16):
    S = len(widths)
    t = np.arange(L)
    k = np.arange(L)
    M = np.zeros((S, L, L), dtype=np.float32)
    for si, w in enumerate(widths):
        Nw = int(min(10 * w, L))
        # scipy.signal.cwt: conj(ricker(Nw, w)[::-1]); ricker is real & symmetric.
        ker = _ricker(Nw, float(w))[::-1]
        off = (Nw - 1) // 2
        idx = t[:, None] + off - k[None, :]          # full-conv index, 'same' offset
        valid = (idx >= 0) & (idx < Nw)
        M[si] = np.where(valid, ker[np.clip(idx, 0, Nw - 1)], 0.0)
    # cwt_flat[b, :] = x[b, :] @ Wmat, Wmat: [L, S*L]
    wmat = M.reshape(S * L, L).T.astype(np.float32)
    return jnp.asarray(wmat).astype(dtype)


# ---------------------------------------------------------------------------
# Hardware query (safe fallbacks if unavailable).
# ---------------------------------------------------------------------------
def _tpu_hw():
    vmem_cap = 32 * 1024 * 1024      # conservative default
    num_cores = 1
    try:
        info = pltpu.get_tpu_info()
        vmem_cap = int(getattr(info, "vmem_capacity_bytes", vmem_cap))
        for attr in ("num_cores", "core_count", "num_tensorcores",
                     "tensorcores_per_chip"):
            v = getattr(info, attr, None)
            if v is not None:
                num_cores = int(v)
                break
    except Exception:
        pass
    return vmem_cap, max(1, num_cores)


def _vmem_limit(footprint_bytes, vmem_cap):
    # Footprint * 2 + slack for compiler-internal buffers; never request more
    # than half the physical VMEM (v7x has only 64 MiB per TensorCore).
    want = int(2 * footprint_bytes) + (4 << 20)
    want = max(want, 16 << 20)
    cap = max(vmem_cap // 2, 16 << 20)
    return int(min(want, cap))


def _plan_stream(N, L, w_bytes, vmem_cap, num_cores):
    """Pick (core_split, tile_n, n_tiles) for the streamed-W path, or None.

    Prefers the LARGEST tile fitting a generation-aware budget so per-tile DMA
    amortizes the fixed grid-step cost, while keeping >= 2 tiles per core so
    the W-tile DMA double-buffers against compute.
    """
    if N % 128:
        return None
    max_tile_bytes = max(vmem_cap // 16, 256 * 1024)
    core_options = (2, 1) if num_cores >= 2 else (1,)
    for ncores in core_options:
        for tn in range(N, 127, -128):
            if N % tn:
                continue
            nt = N // tn
            if nt % ncores:
                continue
            if nt // ncores < 2:
                continue
            if L * tn * w_bytes > max_tile_bytes:
                continue
            return ncores, tn, nt
    return None


# ---------------------------------------------------------------------------
# Fast path: whole W resident in VMEM, single invocation, one dot.
# ---------------------------------------------------------------------------
def _fast_kernel(o_ref, t_ref, w_ref, out_ref, *, n_cwt, alpha):
    d = o_ref[...] - t_ref[...]                                    # [B, L] f32
    wave = jnp.mean(jnp.abs(d))                                    # waveform L1
    cwt_d = jnp.dot(d.astype(w_ref.dtype), w_ref[...],
                    preferred_element_type=jnp.float32)            # [B, N] f32
    cwt = jnp.sum(jnp.abs(cwt_d)) * (1.0 / n_cwt)                  # CWT L1
    out_ref[0, 0] = alpha * wave + (1.0 - alpha) * cwt


# ---------------------------------------------------------------------------
# Streaming path: W streamed tile-by-tile along N; grid = (core_split, nt/core).
# Lane-parallel VMEM accumulator; single cross-lane reduce in the finalize.
# ---------------------------------------------------------------------------
def _stream_kernel(o_ref, t_ref, w_ref, out_ref, d_ref, wave_ref, acc_ref, *,
                   n_cwt, alpha):
    c = pl.program_id(0)
    j = pl.program_id(1)
    nt = pl.num_programs(1)

    @pl.when(j == 0)
    def _init():
        d = o_ref[...] - t_ref[...]                    # [B, L] f32, computed once
        wave_ref[0, 0] = jnp.mean(jnp.abs(d))          # waveform L1, once per partial
        d_ref[...] = d.astype(d_ref.dtype)             # low-precision cast, once
        acc_ref[...] = jnp.zeros_like(acc_ref)

    # CWT of the difference via one MXU matmul against the W tile.
    cwt_d = jnp.dot(d_ref[...], w_ref[...],
                    preferred_element_type=jnp.float32)            # [B, TN] f32
    acc_ref[...] += jnp.abs(cwt_d)                                 # VPU add only

    @pl.when(j == nt - 1)
    def _finalize():
        cwt_part = (1.0 - alpha) * jnp.sum(acc_ref[...]) * (1.0 / n_cwt)
        # Waveform L1 term is added exactly once (by core/partial 0 only).
        wave_part = jnp.where(c == 0, alpha * wave_ref[0, 0], 0.0)
        out_ref[0, 0] = cwt_part + wave_part


@functools.partial(jax.jit, static_argnames=("force_stream",))
def combined_loss(outputs, targets, wmat, force_stream=False):
    B, L = outputs.shape
    Lw, N = wmat.shape
    assert Lw == L
    w_bytes = jnp.dtype(wmat.dtype).itemsize
    vmem_cap, num_cores = _tpu_hw()

    w_total = L * N * w_bytes
    io_bytes = 2 * B * L * 4
    cost = pl.CostEstimate(flops=2 * B * L * N,
                           transcendentals=0,
                           bytes_accessed=w_total + io_bytes + 4)

    plan = _plan_stream(N, L, w_bytes, vmem_cap, num_cores)
    small_w = w_total <= min(vmem_cap // 8, 8 << 20)
    use_fast = (small_w and not force_stream) or plan is None

    if use_fast:
        kernel = functools.partial(_fast_kernel,
                                   n_cwt=float(B * N), alpha=float(ALPHA))
        footprint = w_total + io_bytes + B * N * 4     # + cwt_d intermediate
        out = pl.pallas_call(
            kernel,
            out_shape=jax.ShapeDtypeStruct((1, 1), jnp.float32),
            in_specs=[pl.BlockSpec(memory_space=pltpu.MemorySpace.VMEM)] * 3,
            out_specs=pl.BlockSpec(memory_space=pltpu.MemorySpace.SMEM),
            compiler_params=pltpu.CompilerParams(
                vmem_limit_bytes=_vmem_limit(footprint, vmem_cap)),
            cost_estimate=cost,
        )(outputs, targets, wmat)
        return out[0, 0]

    ncores, tn, nt = plan
    nt_per_core = nt // ncores
    kernel = functools.partial(_stream_kernel,
                               n_cwt=float(B * N), alpha=float(ALPHA))
    footprint = (2 * L * tn * w_bytes        # double-buffered W tile
                 + 2 * io_bytes              # o, t (double-buffered)
                 + B * L * w_bytes           # d scratch
                 + B * tn * 4)               # lane-parallel accumulator

    partials = pl.pallas_call(
        kernel,
        out_shape=jax.ShapeDtypeStruct((ncores, 1), jnp.float32),
        grid=(ncores, nt_per_core),
        in_specs=[
            pl.BlockSpec((B, L), lambda c, j: (0, 0)),
            pl.BlockSpec((B, L), lambda c, j: (0, 0)),
            pl.BlockSpec((L, tn),
                         lambda c, j, _npc=nt_per_core: (0, c * _npc + j)),
        ],
        out_specs=pl.BlockSpec((1, 1), lambda c, j: (c, 0),
                               memory_space=pltpu.MemorySpace.SMEM),
        scratch_shapes=[
            pltpu.VMEM((B, L), wmat.dtype),            # d (low-precision), once
            pltpu.SMEM((1, 1), jnp.float32),           # waveform L1 term
            pltpu.VMEM((B, tn), jnp.float32),          # lane-parallel |cwt| acc
        ],
        compiler_params=pltpu.CompilerParams(
            dimension_semantics=("parallel", "arbitrary"),
            vmem_limit_bytes=_vmem_limit(footprint, vmem_cap)),
        cost_estimate=cost,
    )(outputs, targets, wmat)
    return jnp.sum(partials)


# Pure-JAX f32 reference (same math as the PyTorch module) for a sanity check.
def combined_loss_ref(outputs, targets, wmat_f32):
    l1_wave = jnp.mean(jnp.abs(outputs - targets))
    l1_cwt = jnp.mean(jnp.abs(outputs @ wmat_f32 - targets @ wmat_f32))
    return ALPHA * l1_wave + (1.0 - ALPHA) * l1_cwt


if __name__ == "__main__":
    B, L = 2, 128
    widths = np.arange(1, 37)                           # 36 scales, as in the module

    wmat_f32 = build_cwt_matrix(L, widths, dtype=jnp.float32)   # [128, 4608] reference
    wmat = wmat_f32.astype(jnp.bfloat16)                        # used by the kernel

    key = jax.random.PRNGKey(0)
    k1, k2 = jax.random.split(key)
    outputs = jax.random.normal(k1, (B, L), dtype=jnp.float32)
    targets = jax.random.normal(k2, (B, L), dtype=jnp.float32)

    ref = combined_loss_ref(outputs, targets, wmat_f32)

    # Fast path (default at these sizes: whole W resident, no grid).
    loss_fast = jax.block_until_ready(combined_loss(outputs, targets, wmat))
    np.testing.assert_allclose(np.asarray(loss_fast), np.asarray(ref),
                               rtol=2e-2, atol=2e-3)

    # Streaming path (forced, exercises the W-tile grid / accumulator logic).
    loss_stream = jax.block_until_ready(
        combined_loss(outputs, targets, wmat, force_stream=True))
    np.testing.assert_allclose(np.asarray(loss_stream), np.asarray(ref),
                               rtol=2e-2, atol=2e-3)

    print("KERNEL_OK")
</pallas_src>

<mosaic_0001>
module attributes {stable_mosaic.version = 11 : i64} {
  func.func @_fast_kernel(%arg0: memref<2x128xf32, #tpu.memory_space<vmem>>, %arg1: memref<2x128xf32, #tpu.memory_space<vmem>>, %arg2: memref<128x4608xbf16, #tpu.memory_space<vmem>>, %arg3: memref<1x1xf32, #tpu.memory_space<smem>>) attributes {dimension_semantics = [], scalar_prefetch = 0 : i64, scratch_operands = 0 : i64, tpu.core_type = #tpu.core_type<tc>} {
    %c0 = arith.constant 0 : index
    %c0_0 = arith.constant 0 : index
    %0 = vector.load %arg0[%c0, %c0_0] : memref<2x128xf32, #tpu.memory_space<vmem>>, vector<2x128xf32>
    %c0_1 = arith.constant 0 : index
    %c0_2 = arith.constant 0 : index
    %1 = vector.load %arg1[%c0_1, %c0_2] : memref<2x128xf32, #tpu.memory_space<vmem>>, vector<2x128xf32>
    %2 = arith.subf %0, %1 : vector<2x128xf32>
    %3 = math.absf %2 : vector<2x128xf32>
    %4 = vector.shape_cast %3 : vector<2x128xf32> to vector<1x2x128xf32>
    %cst = arith.constant dense<0.000000e+00> : vector<1xf32>
    %5 = vector.multi_reduction <add>, %4, %cst [1, 2] : vector<1x2x128xf32> to vector<1xf32>
    %6 = vector.shape_cast %5 : vector<1xf32> to vector<1x1x1xf32>
    %7 = vector.extract %6[0, 0, 0] : f32 from vector<1x1x1xf32>
    %cst_3 = arith.constant 2.560000e+02 : f32
    %8 = arith.divf %7, %cst_3 : f32
    %9 = arith.truncf %2 : vector<2x128xf32> to vector<2x128xbf16>
    %c0_4 = arith.constant 0 : index
    %c0_5 = arith.constant 0 : index
    %10 = vector.load %arg2[%c0_4, %c0_5] : memref<128x4608xbf16, #tpu.memory_space<vmem>>, vector<128x4608xbf16>
    %cst_6 = arith.constant dense<0.000000e+00> : vector<2x4608xf32>
    %11 = tpu.matmul %9, %10, %cst_6 {dimension_numbers = #tpu.dot_dimension_numbers<[1], [0], [0], [1], [0, 0, 1, 1], [], []>} : vector<2x128xbf16>, vector<128x4608xbf16>, vector<2x4608xf32> -> vector<2x4608xf32>
    %12 = math.absf %11 : vector<2x4608xf32>
    %13 = vector.shape_cast %12 : vector<2x4608xf32> to vector<1x2x4608xf32>
    %cst_7 = arith.constant dense<0.000000e+00> : vector<1xf32>
    %14 = vector.multi_reduction <add>, %13, %cst_7 [1, 2] : vector<1x2x4608xf32> to vector<1xf32>
    %15 = vector.shape_cast %14 : vector<1xf32> to vector<1x1x1xf32>
    %16 = vector.extract %15[0, 0, 0] : f32 from vector<1x1x1xf32>
    %cst_8 = arith.constant 1.08506945E-4 : f32
    %17 = arith.mulf %16, %cst_8 : f32
    %cst_9 = arith.constant 5.000000e-01 : f32
    %18 = arith.mulf %cst_9, %8 : f32
    %cst_10 = arith.constant 5.000000e-01 : f32
    %19 = arith.mulf %cst_10, %17 : f32
    %20 = arith.addf %18, %19 : f32
    %c0_11 = arith.constant 0 : index
    %c0_12 = arith.constant 0 : index
    %21 = memref.load %arg3[%c0_11, %c0_12] : memref<1x1xf32, #tpu.memory_space<smem>>
    memref.store %20, %arg3[%c0_11, %c0_12] : memref<1x1xf32, #tpu.memory_space<smem>>
    return
  }
}

</mosaic_0001>

<bundles_post_ra>
// kernel: combined_loss.1
= control target key start
LH: loop header
LB: loop body
LE: loop exit
PB: predicated region body
PF: predicated region fallthrough
CT: control target
= control target key end

     0   :  { %8 = vsyncpa [#allocation3], 0  ;;  %s4091_s0 = inlined_call_operand.hbm [shape: f32[2,128], index: 0, kind: input, shape index: {}]   ;;  %s4092_s1 = inlined_call_operand.hbm [shape: f32[2,128], index: 1, kind: input, shape index: {}]   ;;  %s4093_s2 = inlined_call_operand.hbm [shape: bf16[128,4608], index: 2, kind: input, shape index: {}]   ;;  %s4094_s3 = inlined_call_operand.hbm [shape: f32[1,1], index: 3, kind: output, shape index: {}]  }
   0x1   :  { %9 = vsyncpa [#allocation6], 0  ;;  %s27_s14 = sshll.u32 %s4092_s1, 4  ;;  %s28_s14 = int_to_ptr.hbm [resolvable:$true] %s27_s14 }
   0x2   :  { %10 = vsyncpa [#allocation4], 0  ;;  %s3963_s15 = smov [#allocation5]   ;;  %s16_s19 = sshll.u32 %s4091_s0, 4  ;;  %s17_s19 = int_to_ptr.hbm [resolvable:$true] %s16_s19 }
   0x3   :  { %s29_s16 = sshll.u32 %s3963_s15, 4  ;;  %s3964_s20 = smov [#allocation2]   ;;  %s30_s16 = int_to_ptr.vmem [resolvable:$true] %s29_s16 }
   0x4   :  { %32 = dma.hbm_to_vmem [thread:$0]  %s28_s14, 32, %s30_s16, [#allocation6]  }
   0x5   :  { %s18_s21 = sshll.u32 %s3964_s20, 4  ;;  %s37_s24 = sshll.u32 %s4093_s2, 4  ;;  %s19_s21 = int_to_ptr.vmem [resolvable:$true] %s18_s21  ;;  %s38_s24 = int_to_ptr.hbm [resolvable:$true] %s37_s24 }
   0x6   :  { %21 = dma.hbm_to_vmem [thread:$0]  %s17_s19, 32, %s19_s21, [#allocation3]  }
   0x7   :  { %s3965_s1 = smov [#allocation7]   ;;  %s3966_s26 = smov 2304  }
   0x8   :  { %s39_s25 = sshll.u32 %s3965_s1, 4  ;;  %s3967_s27 = smov 144   ;;  %s40_s25 = int_to_ptr.vmem [resolvable:$true] %s39_s25 }
   0x9   :  { %45 = dma.hbm_to_vmem [thread:$0]  %s38_s24, 36864, %s40_s25, [#allocation6], %s3966_s26, %s3966_s26, %s3967_s27  }
   0xa   :  { %3957 = dma.done.wait [#allocation3], 32  }
   0xb   :  { %3958 = vsyncadd [#allocation3], 4294967264 }
   0xc   :  { %3959 = dma.done.wait [#allocation6], 36896  }
   0xd   :  { %3960 = vsyncadd [#allocation6], 4294930400  ;;  %v3428_v0 = vld [vmem:[#allocation7 + $0x7e0] sm:$0xf]  ;;  %v3840_v1 = vld [vmem:[#allocation7 + $0x86c] sm:$0xf0] }
   0xe   :  { %v3822_v2 = vld [vmem:[#allocation7 + $0x7e4] sm:$0xf]  ;;  %v3429_v3 = vor.u32 %v3840_v1, %v3428_v0  ;;  %v3430_v4 = vld [vmem:[#allocation7 + $0x870] sm:$0xf0]  ;;  %v3436_v5 = vld [vmem:[#allocation7 + $0x7e8] sm:$0xf] }
   0xf   :  { %v3841_v6 = vld [vmem:[#allocation7 + $0x874] sm:$0xf0]  ;;  %v3433_v7 = vor.u32 %v3822_v2, %v3430_v4  ;;  %v3823_v9 = vld [vmem:[#allocation7 + $0x7ec] sm:$0xf]  ;;  %v3438_v10 = vld [vmem:[#allocation7 + $0x878] sm:$0xf0] }
  0x10   :  { %v3437_v8 = vor.u32 %v3841_v6, %v3436_v5  ;;  %v3284_v11 = vld [vmem:[#allocation7 + $0x6c0] sm:$0xf]  ;;  %1811 = vmatpush.bf16.msra.mxu0 %v3429_v3  ;;  %v3441_v12 = vor.u32 %v3823_v9, %v3438_v10  ;;  %v3804_v13 = vld [vmem:[#allocation7 + $0x74c] sm:$0xf0]  ;;  %v3786_v14 = vld [vmem:[#allocation7 + $0x6c4] sm:$0xf] }
  0x11   :  { %v3286_v15 = vld [vmem:[#allocation7 + $0x750] sm:$0xf0]  ;;  %1824 = vmatpush.bf16.msra.mxu1 %v3433_v7  ;;  %v3285_v16 = vor.u32 %v3804_v13, %v3284_v11  ;;  %v3292_v18 = vld [vmem:[#allocation7 + $0x6c8] sm:$0xf]  ;;  %v3805_v19 = vld [vmem:[#allocation7 + $0x754] sm:$0xf0] }
  0x12   :  { %1837 = vmatpush.bf16.msra.mxu2 %v3437_v8  ;;  %v3289_v17 = vor.u32 %v3786_v14, %v3286_v15  ;;  %v3787_v20 = vld [vmem:[#allocation7 + $0x6cc] sm:$0xf]  ;;  %1850 = vmatpush.bf16.msra.mxu3 %v3441_v12  ;;  %v3293_v21 = vor.u32 %v3805_v19, %v3292_v18  ;;  %v3294_v22 = vld [vmem:[#allocation7 + $0x758] sm:$0xf0]  ;;  %v3140_v23 = vld [vmem:[#allocation7 + $0x5a0] sm:$0xf] }
  0x13   :  { %v3768_v24 = vld [vmem:[#allocation7 + $0x62c] sm:$0xf0]  ;;  %v3297_v25 = vor.u32 %v3787_v20, %v3294_v22  ;;  %v3750_v26 = vld [vmem:[#allocation7 + $0x5a4] sm:$0xf]  ;;  %v3142_v27 = vld [vmem:[#allocation7 + $0x630] sm:$0xf0] }
  0x14   :  { %v3148_v28 = vld [vmem:[#allocation7 + $0x5a8] sm:$0xf]  ;;  %1812 = vmatpush.bf16.msra.mxu0 %v3285_v16  ;;  %v3141_v29 = vor.u32 %v3768_v24, %v3140_v23  ;;  %v3769_v30 = vld [vmem:[#allocation7 + $0x634] sm:$0xf0]  ;;  %v3751_v31 = vld [vmem:[#allocation7 + $0x5ac] sm:$0xf]  ;;  %v3145_v33 = vor.u32 %v3750_v26, %v3142_v27 }
  0x15   :  { %v3150_v32 = vld [vmem:[#allocation7 + $0x638] sm:$0xf0]  ;;  %1825 = vmatpush.bf16.msra.mxu1 %v3289_v17  ;;  %v3149_v34 = vor.u32 %v3769_v30, %v3148_v28  ;;  %v2996_v35 = vld [vmem:[#allocation7 + $0x480] sm:$0xf]  ;;  %v3732_v36 = vld [vmem:[#allocation7 + $0x50c] sm:$0xf0] }
  0x16   :  { %1838 = vmatpush.bf16.msra.mxu2 %v3293_v21  ;;  %v3714_v37 = vld [vmem:[#allocation7 + $0x484] sm:$0xf]  ;;  %1851 = vmatpush.bf16.msra.mxu3 %v3297_v25  ;;  %v3153_v38 = vor.u32 %v3751_v31, %v3150_v32  ;;  %v2998_v39 = vld [vmem:[#allocation7 + $0x510] sm:$0xf0]  ;;  %v3004_v40 = vld [vmem:[#allocation7 + $0x488] sm:$0xf]  ;;  %v2997_v44 = vor.u32 %v3732_v36, %v2996_v35 }
  0x17   :  { %v3733_v41 = vld [vmem:[#allocation7 + $0x514] sm:$0xf0]  ;;  %v3715_v42 = vld [vmem:[#allocation7 + $0x48c] sm:$0xf]  ;;  %v3006_v43 = vld [vmem:[#allocation7 + $0x518] sm:$0xf0]  ;;  %v3001_v45 = vor.u32 %v3714_v37, %v2998_v39 }
  0x18   :  { %1813 = vmatpush.bf16.msra.mxu0 %v3141_v29  ;;  %v3005_v46 = vor.u32 %v3733_v41, %v3004_v40  ;;  %v2852_v47 = vld [vmem:[#allocation7 + $0x360] sm:$0xf]  ;;  %v3696_v48 = vld [vmem:[#allocation7 + $0x3ec] sm:$0xf0]  ;;  %v3678_v49 = vld [vmem:[#allocation7 + $0x364] sm:$0xf]  ;;  %v3009_v50 = vor.u32 %v3715_v42, %v3006_v43 }
  0x19   :  { %1826 = vmatpush.bf16.msra.mxu1 %v3145_v33  ;;  %v2854_v51 = vld [vmem:[#allocation7 + $0x3f0] sm:$0xf0]  ;;  %v2860_v52 = vld [vmem:[#allocation7 + $0x368] sm:$0xf]  ;;  %v3697_v53 = vld [vmem:[#allocation7 + $0x3f4] sm:$0xf0]  ;;  %v2853_v56 = vor.u32 %v3696_v48, %v2852_v47 }
  0x1a   :  { %1839 = vmatpush.bf16.msra.mxu2 %v3149_v34  ;;  %1852 = vmatpush.bf16.msra.mxu3 %v3153_v38  ;;  %v3679_v54 = vld [vmem:[#allocation7 + $0x36c] sm:$0xf]  ;;  %v2862_v55 = vld [vmem:[#allocation7 + $0x3f8] sm:$0xf0]  ;;  %v2857_v57 = vor.u32 %v3678_v49, %v2854_v51  ;;  %v2861_v58 = vor.u32 %v3697_v53, %v2860_v52  ;;  %v2708_v59 = vld [vmem:[#allocation7 + $0x240] sm:$0xf] }
  0x1b   :  { %v3660_v60 = vld [vmem:[#allocation7 + $0x2cc] sm:$0xf0]  ;;  %v3642_v61 = vld [vmem:[#allocation7 + $0x244] sm:$0xf]  ;;  %v2865_v62 = vor.u32 %v3679_v54, %v2862_v55  ;;  %v2710_v63 = vld [vmem:[#allocation7 + $0x2d0] sm:$0xf0] }
  0x1c   :  { %1814 = vmatpush.bf16.msra.mxu0 %v2997_v44  ;;  %v2716_v0 = vld [vmem:[#allocation7 + $0x248] sm:$0xf]  ;;  %v3661_v1 = vld [vmem:[#allocation7 + $0x2d4] sm:$0xf0]  ;;  %v3643_v2 = vld [vmem:[#allocation7 + $0x24c] sm:$0xf]  ;;  %v2709_v4 = vor.u32 %v3660_v60, %v2708_v59  ;;  %v2713_v5 = vor.u32 %v3642_v61, %v2710_v63 }
  0x1d   :  { %1827 = vmatpush.bf16.msra.mxu1 %v3001_v45  ;;  %v2718_v3 = vld [vmem:[#allocation7 + $0x2d8] sm:$0xf0]  ;;  %v2717_v6 = vor.u32 %v3661_v1, %v2716_v0  ;;  %v2564_v7 = vld [vmem:[#allocation7 + $0x120] sm:$0xf]  ;;  %v3624_v8 = vld [vmem:[#allocation7 + $0x1ac] sm:$0xf0] }
  0x1e   :  { %1840 = vmatpush.bf16.msra.mxu2 %v3005_v46  ;;  %1853 = vmatpush.bf16.msra.mxu3 %v3009_v50  ;;  %v3606_v9 = vld [vmem:[#allocation7 + $0x124] sm:$0xf]  ;;  %v2721_v10 = vor.u32 %v3643_v2, %v2718_v3  ;;  %v2566_v11 = vld [vmem:[#allocation7 + $0x1b0] sm:$0xf0]  ;;  %v2572_v12 = vld [vmem:[#allocation7 + $0x128] sm:$0xf]  ;;  %v2565_v16 = vor.u32 %v3624_v8, %v2564_v7 }
  0x1f   :  { %v3625_v13 = vld [vmem:[#allocation7 + $0x1b4] sm:$0xf0]  ;;  %v3607_v14 = vld [vmem:[#allocation7 + $0x12c] sm:$0xf]  ;;  %v2574_v15 = vld [vmem:[#allocation7 + $0x1b8] sm:$0xf0]  ;;  %v2569_v19 = vor.u32 %v3606_v9, %v2566_v11 }
  0x20   :  { %1815 = vmatpush.bf16.msra.mxu0 %v2853_v56  ;;  %v2420_v17 = vld [vmem:[#allocation7] sm:$0xf]  ;;  %v3588_v18 = vld [vmem:[#allocation7 + $0x8c] sm:$0xf0]  ;;  %v2573_v20 = vor.u32 %v3625_v13, %v2572_v12  ;;  %v3570_v21 = vld [vmem:[#allocation7 + $0x4] sm:$0xf]  ;;  %v2577_v24 = vor.u32 %v3607_v14, %v2574_v15 }
  0x21   :  { %1828 = vmatpush.bf16.msra.mxu1 %v2857_v57  ;;  %v2422_v22 = vld [vmem:[#allocation7 + $0x90] sm:$0xf0]  ;;  %v2428_v23 = vld [vmem:[#allocation7 + $0x8] sm:$0xf]  ;;  %v3589_v25 = vld [vmem:[#allocation7 + $0x94] sm:$0xf0]  ;;  %v2421_v31 = vor.u32 %v3588_v18, %v2420_v17 }
  0x22   :  { %1841 = vmatpush.bf16.msra.mxu2 %v2861_v58  ;;  %1854 = vmatpush.bf16.msra.mxu3 %v2865_v62  ;;  %v3571_v26 = vld [vmem:[#allocation7 + $0xc] sm:$0xf]  ;;  %v2430_v27 = vld [vmem:[#allocation7 + $0x98] sm:$0xf0]  ;;  %v3444_v28 = vld [vmem:[#allocation7 + $0x7f0] sm:$0xf]  ;;  %v2425_v35 = vor.u32 %v3570_v21, %v2422_v22  ;;  %v2429_v36 = vor.u32 %v3589_v25, %v2428_v23 }
  0x23   :  { %v3842_v29 = vld [vmem:[#allocation7 + $0x87c] sm:$0xf0]  ;;  %v3824_v30 = vld [vmem:[#allocation7 + $0x7f4] sm:$0xf]  ;;  %v3446_v32 = vld [vmem:[#allocation7 + $0x880] sm:$0xf0]  ;;  %v2433_v39 = vor.u32 %v3571_v26, %v2430_v27 }
  0x24   :  { %1816 = vmatpush.bf16.msra.mxu0 %v2709_v4  ;;  %v3452_v33 = vld [vmem:[#allocation7 + $0x7f8] sm:$0xf]  ;;  %v3843_v34 = vld [vmem:[#allocation7 + $0x884] sm:$0xf0]  ;;  %v3825_v37 = vld [vmem:[#allocation7 + $0x7fc] sm:$0xf]  ;;  %v3445_v40 = vor.u32 %v3842_v29, %v3444_v28  ;;  %v3449_v41 = vor.u32 %v3824_v30, %v3446_v32 }
  0x25   :  { %1829 = vmatpush.bf16.msra.mxu1 %v2713_v5  ;;  %v3454_v38 = vld [vmem:[#allocation7 + $0x888] sm:$0xf0]  ;;  %v3453_v42 = vor.u32 %v3843_v34, %v3452_v33  ;;  %v3300_v43 = vld [vmem:[#allocation7 + $0x6d0] sm:$0xf]  ;;  %v3806_v44 = vld [vmem:[#allocation7 + $0x75c] sm:$0xf0] }
  0x26   :  { %1842 = vmatpush.bf16.msra.mxu2 %v2717_v6  ;;  %1855 = vmatpush.bf16.msra.mxu3 %v2721_v10  ;;  %v3788_v45 = vld [vmem:[#allocation7 + $0x6d4] sm:$0xf]  ;;  %v3457_v46 = vor.u32 %v3825_v37, %v3454_v38  ;;  %v3302_v47 = vld [vmem:[#allocation7 + $0x760] sm:$0xf0]  ;;  %v3308_v48 = vld [vmem:[#allocation7 + $0x6d8] sm:$0xf]  ;;  %v3301_v52 = vor.u32 %v3806_v44, %v3300_v43 }
  0x27   :  { %v3807_v49 = vld [vmem:[#allocation7 + $0x764] sm:$0xf0]  ;;  %v3789_v50 = vld [vmem:[#allocation7 + $0x6dc] sm:$0xf]  ;;  %v3310_v51 = vld [vmem:[#allocation7 + $0x768] sm:$0xf0]  ;;  %v3305_v55 = vor.u32 %v3788_v45, %v3302_v47 }
  0x28   :  { %1817 = vmatpush.bf16.msra.mxu0 %v2565_v16  ;;  %v3156_v53 = vld [vmem:[#allocation7 + $0x5b0] sm:$0xf]  ;;  %v3770_v54 = vld [vmem:[#allocation7 + $0x63c] sm:$0xf0]  ;;  %v3309_v56 = vor.u32 %v3807_v49, %v3308_v48  ;;  %v3752_v57 = vld [vmem:[#allocation7 + $0x5b4] sm:$0xf]  ;;  %v3313_v60 = vor.u32 %v3789_v50, %v3310_v51 }
  0x29   :  { %1830 = vmatpush.bf16.msra.mxu1 %v2569_v19  ;;  %v3158_v58 = vld [vmem:[#allocation7 + $0x640] sm:$0xf0]  ;;  %v58_v59 = vld [vmem:[#allocation2] sm:$0x3]  ;;  %v3164_v61 = vld [vmem:[#allocation7 + $0x5b8] sm:$0xf]  ;;  %v3157_v3 = vor.u32 %v3770_v54, %v3156_v53 }
  0x2a   :  { %1843 = vmatpush.bf16.msra.mxu2 %v2573_v20  ;;  %1856 = vmatpush.bf16.msra.mxu3 %v2577_v24  ;;  %v3771_v62 = vld [vmem:[#allocation7 + $0x644] sm:$0xf0]  ;;  %v59_v63 = vld [vmem:[#allocation5] sm:$0x3]  ;;  %v3166_v1 = vld [vmem:[#allocation7 + $0x648] sm:$0xf0]  ;;  %v3161_v4 = vor.u32 %v3752_v57, %v3158_v58 }
  0x2b   :  { %v3753_v0 = vld [vmem:[#allocation7 + $0x5bc] sm:$0xf]  ;;  %v3999_v2 = vsub.f32 %v58_v59, %v59_v63  ;;  %v3165_v5 = vor.u32 %v3771_v62, %v3164_v61  ;;  %v3012_v6 = vld [vmem:[#allocation7 + $0x490] sm:$0xf]  ;;  %v3734_v7 = vld [vmem:[#allocation7 + $0x51c] sm:$0xf0] }
  0x2c   :  { %1818 = vmatpush.bf16.msra.mxu0 %v2421_v31  ;;  %v3716_v8 = vld [vmem:[#allocation7 + $0x494] sm:$0xf]  ;;  %v3169_v10 = vor.u32 %v3753_v0, %v3166_v1  ;;  %v3014_v11 = vld [vmem:[#allocation7 + $0x520] sm:$0xf0]  ;;  %v3020_v12 = vld [vmem:[#allocation7 + $0x498] sm:$0xf]  ;;  %v3013_v16 = vor.u32 %v3734_v7, %v3012_v6 }
  0x2d   :  { %1831 = vmatpush.bf16.msra.mxu1 %v2425_v35  ;;  %v4003_v9 = vpack.c.bf16 %v3999_v2, %v3999_v2  ;;  %v3735_v13 = vld [vmem:[#allocation7 + $0x524] sm:$0xf0]  ;;  %v3717_v14 = vld [vmem:[#allocation7 + $0x49c] sm:$0xf]  ;;  %v3022_v15 = vld [vmem:[#allocation7 + $0x528] sm:$0xf0]  ;;  %v3017_v17 = vor.u32 %v3716_v8, %v3014_v11 }
  0x2e   :  { %1844 = vmatpush.bf16.msra.mxu2 %v2429_v36  ;;  %1857 = vmatpush.bf16.msra.mxu3 %v2433_v39  ;;  %v3021_v18 = vor.u32 %v3735_v13, %v3020_v12  ;;  %v2868_v19 = vld [vmem:[#allocation7 + $0x370] sm:$0xf]  ;;  %v3698_v20 = vld [vmem:[#allocation7 + $0x3fc] sm:$0xf0]  ;;  %v3680_v21 = vld [vmem:[#allocation7 + $0x374] sm:$0xf]  ;;  %v3025_v22 = vor.u32 %v3717_v14, %v3022_v15 }
  0x2f   :  { %1819 = vmatmul.bf16.vlgmr.msra.gmra.mxu0 %v4003_v9  ;;  %v2870_v23 = vld [vmem:[#allocation7 + $0x400] sm:$0xf0]  ;;  %v2876_v24 = vld [vmem:[#allocation7 + $0x378] sm:$0xf]  ;;  %v3699_v25 = vld [vmem:[#allocation7 + $0x404] sm:$0xf0]  ;;  %v2869_v28 = vor.u32 %v3698_v20, %v2868_v19 }
  0x30   :  { %1863 = vmatpush.bf16.msrb.mxu0 %v3445_v40  ;;  %1832 = vmatmul.bf16.vlgmr.msra.gmra.mxu1 %v4003_v9  ;;  %v3681_v26 = vld [vmem:[#allocation7 + $0x37c] sm:$0xf]  ;;  %v2878_v27 = vld [vmem:[#allocation7 + $0x408] sm:$0xf0]  ;;  %v2873_v29 = vor.u32 %v3680_v21, %v2870_v23  ;;  %v2877_v30 = vor.u32 %v3699_v25, %v2876_v24  ;;  %v2724_v31 = vld [vmem:[#allocation7 + $0x250] sm:$0xf] }
  0x31   :  { %1876 = vmatpush.bf16.msrb.mxu1 %v3449_v41  ;;  %1845 = vmatmul.bf16.vlgmr.msra.gmra.mxu2 %v4003_v9  ;;  %v3662_v32 = vld [vmem:[#allocation7 + $0x2dc] sm:$0xf0]  ;;  %v3644_v33 = vld [vmem:[#allocation7 + $0x254] sm:$0xf]  ;;  %v2881_v34 = vor.u32 %v3681_v26, %v2878_v27  ;;  %v2726_v35 = vld [vmem:[#allocation7 + $0x2e0] sm:$0xf0] }
  0x32   :  { %1889 = vmatpush.bf16.msrb.mxu2 %v3453_v42  ;;  %1902 = vmatpush.bf16.msrb.mxu3 %v3457_v46  ;;  %v2732_v36 = vld [vmem:[#allocation7 + $0x258] sm:$0xf]  ;;  %v3663_v37 = vld [vmem:[#allocation7 + $0x2e4] sm:$0xf0]  ;;  %v3645_v38 = vld [vmem:[#allocation7 + $0x25c] sm:$0xf]  ;;  %v2725_v40 = vor.u32 %v3662_v32, %v2724_v31  ;;  %v2729_v41 = vor.u32 %v3644_v33, %v2726_v35 }
  0x33   :  { %1858 = vmatmul.bf16.vlgmr.msra.gmra.mxu3 %v4003_v9  ;;  %v2734_v39 = vld [vmem:[#allocation7 + $0x2e8] sm:$0xf0]  ;;  %v2733_v42 = vor.u32 %v3663_v37, %v2732_v36  ;;  %v2580_v43 = vld [vmem:[#allocation7 + $0x130] sm:$0xf]  ;;  %v3626_v44 = vld [vmem:[#allocation7 + $0x1bc] sm:$0xf0] }
  0x34   :  { %1864 = vmatpush.bf16.msrb.mxu0 %v3301_v52  ;;  %v3608_v45 = vld [vmem:[#allocation7 + $0x134] sm:$0xf]  ;;  %v2737_v46 = vor.u32 %v3645_v38, %v2734_v39  ;;  %v2582_v47 = vld [vmem:[#allocation7 + $0x1c0] sm:$0xf0]  ;;  %v2588_v48 = vld [vmem:[#allocation7 + $0x138] sm:$0xf]  ;;  %v2581_v52 = vor.u32 %v3626_v44, %v2580_v43 }
  0x35   :  { %1877 = vmatpush.bf16.msrb.mxu1 %v3305_v55  ;;  %v3627_v49 = vld [vmem:[#allocation7 + $0x1c4] sm:$0xf0]  ;;  %v3609_v50 = vld [vmem:[#allocation7 + $0x13c] sm:$0xf]  ;;  %v2590_v51 = vld [vmem:[#allocation7 + $0x1c8] sm:$0xf0]  ;;  %v2585_v55 = vor.u32 %v3608_v45, %v2582_v47 }
  0x36   :  { %1890 = vmatpush.bf16.msrb.mxu2 %v3309_v56  ;;  %1903 = vmatpush.bf16.msrb.mxu3 %v3313_v60  ;;  %v2436_v53 = vld [vmem:[#allocation7 + $0x10] sm:$0xf]  ;;  %v3590_v54 = vld [vmem:[#allocation7 + $0x9c] sm:$0xf0]  ;;  %v2589_v56 = vor.u32 %v3627_v49, %v2588_v48  ;;  %v3572_v57 = vld [vmem:[#allocation7 + $0x14] sm:$0xf]  ;;  %v2593_v60 = vor.u32 %v3609_v50, %v2590_v51 }
  0x37   :  { %v2438_v58 = vld [vmem:[#allocation7 + $0xa0] sm:$0xf0]  ;;  %v2444_v59 = vld [vmem:[#allocation7 + $0x18] sm:$0xf]  ;;  %v3591_v61 = vld [vmem:[#allocation7 + $0xa4] sm:$0xf0] }
  0x38   :  { %1865 = vmatpush.bf16.msrb.mxu0 %v3157_v3  ;;  %v3573_v62 = vld [vmem:[#allocation7 + $0x1c] sm:$0xf]  ;;  %v2446_v63 = vld [vmem:[#allocation7 + $0xa8] sm:$0xf0]  ;;  %v3460_v0 = vld [vmem:[#allocation7 + $0x800] sm:$0xf]  ;;  %v2441_v8 = vor.u32 %v3572_v57, %v2438_v58 }
  0x39   :  { %1878 = vmatpush.bf16.msrb.mxu1 %v3161_v4  ;;  %v3844_v1 = vld [vmem:[#allocation7 + $0x88c] sm:$0xf0]  ;;  %v3826_v3 = vld [vmem:[#allocation7 + $0x804] sm:$0xf]  ;;  %v2437_v4 = vor.u32 %v3590_v54, %v2436_v53  ;;  %v3468_v6 = vld [vmem:[#allocation7 + $0x808] sm:$0xf]  ;;  %v2449_v13 = vor.u32 %v3573_v62, %v2446_v63 }
  0x3a   :  { %1891 = vmatpush.bf16.msrb.mxu2 %v3165_v5  ;;  %1904 = vmatpush.bf16.msrb.mxu3 %v3169_v10  ;;  %v3462_v5 = vld [vmem:[#allocation7 + $0x890] sm:$0xf0]  ;;  %v3845_v7 = vld [vmem:[#allocation7 + $0x894] sm:$0xf0]  ;;  %v2445_v10 = vor.u32 %v3591_v61, %v2444_v59  ;;  %v3827_v11 = vld [vmem:[#allocation7 + $0x80c] sm:$0xf]  ;;  %v3461_v14 = vor.u32 %v3844_v1, %v3460_v0 }
  0x3b   :  { %v3470_v12 = vld [vmem:[#allocation7 + $0x898] sm:$0xf0]  ;;  %v3465_v15 = vor.u32 %v3826_v3, %v3462_v5  ;;  %v3790_v19 = vld [vmem:[#allocation7 + $0x6e4] sm:$0xf]  ;;  %v3318_v21 = vld [vmem:[#allocation7 + $0x770] sm:$0xf0] }
  0x3c   :  { %1866 = vmatpush.bf16.msrb.mxu0 %v3013_v16  ;;  %v3469_v16 = vor.u32 %v3845_v7, %v3468_v6  ;;  %v3473_v20 = vor.u32 %v3827_v11, %v3470_v12  ;;  %v3809_v23 = vld [vmem:[#allocation7 + $0x774] sm:$0xf0]  ;;  %v3791_v24 = vld [vmem:[#allocation7 + $0x6ec] sm:$0xf]  ;;  %v3326_v25 = vld [vmem:[#allocation7 + $0x778] sm:$0xf0]  ;;  %v3321_v27 = vor.u32 %v3790_v19, %v3318_v21 }
  0x3d   :  { %1879 = vmatpush.bf16.msrb.mxu1 %v3017_v17  ;;  %v3316_v17 = vld [vmem:[#allocation7 + $0x6e0] sm:$0xf]  ;;  %v3754_v31 = vld [vmem:[#allocation7 + $0x5c4] sm:$0xf]  ;;  %v3329_v32 = vor.u32 %v3791_v24, %v3326_v25  ;;  %v3174_v33 = vld [vmem:[#allocation7 + $0x650] sm:$0xf0] }
  0x3e   :  { %1892 = vmatpush.bf16.msrb.mxu2 %v3021_v18  ;;  %1905 = vmatpush.bf16.msrb.mxu3 %v3025_v22  ;;  %v3808_v18 = vld [vmem:[#allocation7 + $0x76c] sm:$0xf0]  ;;  %v3324_v22 = vld [vmem:[#allocation7 + $0x6e8] sm:$0xf]  ;;  %v3773_v35 = vld [vmem:[#allocation7 + $0x654] sm:$0xf0]  ;;  %v3177_v39 = vor.u32 %v3754_v31, %v3174_v33 }
  0x3f   :  { %v3317_v26 = vor.u32 %v3808_v18, %v3316_v17  ;;  %v3755_v36 = vld [vmem:[#allocation7 + $0x5cc] sm:$0xf]  ;;  %v3182_v37 = vld [vmem:[#allocation7 + $0x658] sm:$0xf0]  ;;  %v3718_v43 = vld [vmem:[#allocation7 + $0x4a4] sm:$0xf] }
  0x40   :  { %1867 = vmatpush.bf16.msrb.mxu0 %v2869_v28  ;;  %v3325_v28 = vor.u32 %v3809_v23, %v3324_v22  ;;  %v3185_v44 = vor.u32 %v3755_v36, %v3182_v37  ;;  %v3030_v45 = vld [vmem:[#allocation7 + $0x530] sm:$0xf0]  ;;  %v3737_v47 = vld [vmem:[#allocation7 + $0x534] sm:$0xf0]  ;;  %v3719_v48 = vld [vmem:[#allocation7 + $0x4ac] sm:$0xf] }
  0x41   :  { %1880 = vmatpush.bf16.msrb.mxu1 %v2873_v29  ;;  %v3172_v29 = vld [vmem:[#allocation7 + $0x5c0] sm:$0xf]  ;;  %v3038_v49 = vld [vmem:[#allocation7 + $0x538] sm:$0xf0]  ;;  %v3033_v51 = vor.u32 %v3718_v43, %v3030_v45  ;;  %v3700_v54 = vld [vmem:[#allocation7 + $0x40c] sm:$0xf0] }
  0x42   :  { %1893 = vmatpush.bf16.msrb.mxu2 %v2877_v30  ;;  %1906 = vmatpush.bf16.msrb.mxu3 %v2881_v34  ;;  %v3772_v30 = vld [vmem:[#allocation7 + $0x64c] sm:$0xf0]  ;;  %v3180_v34 = vld [vmem:[#allocation7 + $0x5c8] sm:$0xf]  ;;  %v2884_v53 = vld [vmem:[#allocation7 + $0x380] sm:$0xf] }
  0x43   :  { %v3173_v38 = vor.u32 %v3772_v30, %v3172_v29  ;;  %v2886_v57 = vld [vmem:[#allocation7 + $0x410] sm:$0xf0]  ;;  %v2892_v58 = vld [vmem:[#allocation7 + $0x388] sm:$0xf]  ;;  %v3701_v59 = vld [vmem:[#allocation7 + $0x414] sm:$0xf0]  ;;  %v2885_v62 = vor.u32 %v3700_v54, %v2884_v53 }
  0x44   :  { %1868 = vmatpush.bf16.msrb.mxu0 %v2725_v40  ;;  %v3181_v40 = vor.u32 %v3773_v35, %v3180_v34  ;;  %v2894_v61 = vld [vmem:[#allocation7 + $0x418] sm:$0xf0]  ;;  %v2893_v0 = vor.u32 %v3701_v59, %v2892_v58  ;;  %v2740_v1 = vld [vmem:[#allocation7 + $0x260] sm:$0xf]  ;;  %v3664_v3 = vld [vmem:[#allocation7 + $0x2ec] sm:$0xf0] }
  0x45   :  { %1881 = vmatpush.bf16.msrb.mxu1 %v2729_v41  ;;  %v3028_v41 = vld [vmem:[#allocation7 + $0x4a0] sm:$0xf]  ;;  %v2742_v6 = vld [vmem:[#allocation7 + $0x2f0] sm:$0xf0]  ;;  %v2748_v7 = vld [vmem:[#allocation7 + $0x268] sm:$0xf]  ;;  %v2741_v12 = vor.u32 %v3664_v3, %v2740_v1 }
  0x46   :  { %1894 = vmatpush.bf16.msrb.mxu2 %v2733_v42  ;;  %1907 = vmatpush.bf16.msrb.mxu3 %v2737_v46  ;;  %v3736_v42 = vld [vmem:[#allocation7 + $0x52c] sm:$0xf0]  ;;  %v3036_v46 = vld [vmem:[#allocation7 + $0x4a8] sm:$0xf]  ;;  %v2750_v11 = vld [vmem:[#allocation7 + $0x2f8] sm:$0xf0] }
  0x47   :  { %v3029_v50 = vor.u32 %v3736_v42, %v3028_v41  ;;  %v3610_v17 = vld [vmem:[#allocation7 + $0x144] sm:$0xf]  ;;  %v2598_v19 = vld [vmem:[#allocation7 + $0x1d0] sm:$0xf0]  ;;  %v3629_v21 = vld [vmem:[#allocation7 + $0x1d4] sm:$0xf0] }
  0x48   :  { %1869 = vmatpush.bf16.msrb.mxu0 %v2581_v52  ;;  %v3037_v52 = vor.u32 %v3737_v47, %v3036_v46  ;;  %v3611_v22 = vld [vmem:[#allocation7 + $0x14c] sm:$0xf]  ;;  %v2606_v23 = vld [vmem:[#allocation7 + $0x1d8] sm:$0xf0]  ;;  %v2452_v25 = vld [vmem:[#allocation7 + $0x20] sm:$0xf] }
  0x49   :  { %1882 = vmatpush.bf16.msrb.mxu1 %v2585_v55  ;;  %v3682_v55 = vld [vmem:[#allocation7 + $0x384] sm:$0xf]  ;;  %v2454_v30 = vld [vmem:[#allocation7 + $0xb0] sm:$0xf0]  ;;  %v2460_v31 = vld [vmem:[#allocation7 + $0x28] sm:$0xf] }
  0x4a   :  { %1895 = vmatpush.bf16.msrb.mxu2 %v2589_v56  ;;  %1908 = vmatpush.bf16.msrb.mxu3 %v2593_v60  ;;  %v3041_v56 = vor.u32 %v3719_v48, %v3038_v49  ;;  %v3683_v60 = vld [vmem:[#allocation7 + $0x38c] sm:$0xf]  ;;  %v2889_v63 = vor.u32 %v3682_v55, %v2886_v57  ;;  %v3574_v29 = vld [vmem:[#allocation7 + $0x24] sm:$0xf]  ;;  %v3593_v33 = vld [vmem:[#allocation7 + $0xb4] sm:$0xf0] }
  0x4b   :  { %v2897_v5 = vor.u32 %v3683_v60, %v2894_v61  ;;  %v3575_v34 = vld [vmem:[#allocation7 + $0x2c] sm:$0xf]  ;;  %v2462_v35 = vld [vmem:[#allocation7 + $0xb8] sm:$0xf0]  ;;  %v3476_v36 = vld [vmem:[#allocation7 + $0x810] sm:$0xf]  ;;  %v2457_v43 = vor.u32 %v3574_v29, %v2454_v30 }
  0x4c   :  { %1870 = vmatpush.bf16.msrb.mxu0 %v2437_v4  ;;  %v3646_v4 = vld [vmem:[#allocation7 + $0x264] sm:$0xf]  ;;  %v3846_v37 = vld [vmem:[#allocation7 + $0x89c] sm:$0xf0]  ;;  %v3484_v41 = vld [vmem:[#allocation7 + $0x818] sm:$0xf]  ;;  %v2465_v47 = vor.u32 %v3575_v34, %v2462_v35 }
  0x4d   :  { %1883 = vmatpush.bf16.msrb.mxu1 %v2441_v8  ;;  %v3665_v8 = vld [vmem:[#allocation7 + $0x2f4] sm:$0xf0]  ;;  %v3847_v42 = vld [vmem:[#allocation7 + $0x8a4] sm:$0xf0]  ;;  %v3829_v45 = vld [vmem:[#allocation7 + $0x81c] sm:$0xf]  ;;  %v3477_v48 = vor.u32 %v3846_v37, %v3476_v36 }
  0x4e   :  { %1896 = vmatpush.bf16.msrb.mxu2 %v2445_v10  ;;  %1909 = vmatpush.bf16.msrb.mxu3 %v2449_v13  ;;  %v3647_v10 = vld [vmem:[#allocation7 + $0x26c] sm:$0xf]  ;;  %v2745_v13 = vor.u32 %v3646_v4, %v2742_v6  ;;  %v3792_v53 = vld [vmem:[#allocation7 + $0x6f4] sm:$0xf]  ;;  %v3334_v55 = vld [vmem:[#allocation7 + $0x780] sm:$0xf0] }
  0x4f   :  { %1871 = vmatmul.bf16.vlgmr.msrb.gmra.mxu0 %v4003_v9  ;;  %v2753_v18 = vor.u32 %v3647_v10, %v2750_v11  ;;  %v3486_v46 = vld [vmem:[#allocation7 + $0x8a8] sm:$0xf0]  ;;  %v3811_v57 = vld [vmem:[#allocation7 + $0x784] sm:$0xf0]  ;;  %v3793_v58 = vld [vmem:[#allocation7 + $0x6fc] sm:$0xf]  ;;  %v3337_v61 = vor.u32 %v3792_v53, %v3334_v55 }
  0x50   :  { %1915 = vmatpush.bf16.msra.mxu0 %v3461_v14  ;;  %1884 = vmatmul.bf16.vlgmr.msrb.gmra.mxu1 %v4003_v9  ;;  %v2749_v14 = vor.u32 %v3665_v8, %v2748_v7  ;;  %v3489_v54 = vor.u32 %v3829_v45, %v3486_v46  ;;  %v3342_v59 = vld [vmem:[#allocation7 + $0x788] sm:$0xf0]  ;;  %v3756_v1 = vld [vmem:[#allocation7 + $0x5d4] sm:$0xf]  ;;  %v3190_v4 = vld [vmem:[#allocation7 + $0x660] sm:$0xf0] }
  0x51   :  { %1928 = vmatpush.bf16.msra.mxu1 %v3465_v15  ;;  %1897 = vmatmul.bf16.vlgmr.msrb.gmra.mxu2 %v4003_v9  ;;  %v2596_v15 = vld [vmem:[#allocation7 + $0x140] sm:$0xf]  ;;  %v3345_v3 = vor.u32 %v3793_v58, %v3342_v59  ;;  %v3775_v6 = vld [vmem:[#allocation7 + $0x664] sm:$0xf0]  ;;  %v3757_v7 = vld [vmem:[#allocation7 + $0x5dc] sm:$0xf]  ;;  %v3193_v11 = vor.u32 %v3756_v1, %v3190_v4 }
  0x52   :  { %1941 = vmatpush.bf16.msra.mxu2 %v3469_v16  ;;  %1954 = vmatpush.bf16.msra.mxu3 %v3473_v20  ;;  %v3628_v16 = vld [vmem:[#allocation7 + $0x1cc] sm:$0xf0]  ;;  %v2604_v20 = vld [vmem:[#allocation7 + $0x148] sm:$0xf]  ;;  %v3198_v8 = vld [vmem:[#allocation7 + $0x668] sm:$0xf0] }
  0x53   :  { %1910 = vmatmul.bf16.vlgmr.msrb.gmra.mxu3 %v4003_v9  ;;  %v2597_v24 = vor.u32 %v3628_v16, %v2596_v15  ;;  %v3720_v15 = vld [vmem:[#allocation7 + $0x4b4] sm:$0xf]  ;;  %v3201_v16 = vor.u32 %v3757_v7, %v3198_v8  ;;  %v2902_v29 = vld [vmem:[#allocation7 + $0x420] sm:$0xf0]  ;;  %v2908_v30 = vld [vmem:[#allocation7 + $0x398] sm:$0xf] }
  0x54   :  { %1916 = vmatpush.bf16.msra.mxu0 %v3317_v26  ;;  %v3592_v26 = vld [vmem:[#allocation7 + $0xac] sm:$0xf0]  ;;  %v2766_v45 = vld [vmem:[#allocation7 + $0x308] sm:$0xf0]  ;;  %v2614_v53 = vld [vmem:[#allocation7 + $0x1e0] sm:$0xf0] }
  0x55   :  { %1929 = vmatpush.bf16.msra.mxu1 %v3321_v27  ;;  %v2601_v27 = vor.u32 %v3610_v17, %v2598_v19  ;;  %v3046_v17 = vld [vmem:[#allocation7 + $0x540] sm:$0xf0]  ;;  %v3739_v19 = vld [vmem:[#allocation7 + $0x544] sm:$0xf0]  ;;  %v2756_v37 = vld [vmem:[#allocation7 + $0x270] sm:$0xf] }
  0x56   :  { %1942 = vmatpush.bf16.msra.mxu2 %v3325_v28  ;;  %1955 = vmatpush.bf16.msra.mxu3 %v3329_v32  ;;  %v2605_v28 = vor.u32 %v3629_v21, %v2604_v20  ;;  %v2609_v32 = vor.u32 %v3611_v22, %v2606_v23  ;;  %v3721_v20 = vld [vmem:[#allocation7 + $0x4bc] sm:$0xf]  ;;  %v3054_v21 = vld [vmem:[#allocation7 + $0x548] sm:$0xf0]  ;;  %v3049_v23 = vor.u32 %v3720_v15, %v3046_v17  ;;  %v3631_v55 = vld [vmem:[#allocation7 + $0x1e4] sm:$0xf0] }
  0x57   :  { %v2468_v59 = vld [vmem:[#allocation7 + $0x30] sm:$0xf]  ;;  %v2476_v1 = vld [vmem:[#allocation7 + $0x38] sm:$0xf]  ;;  %v3595_v4 = vld [vmem:[#allocation7 + $0xc4] sm:$0xf0] }
  0x58   :  { %1917 = vmatpush.bf16.msra.mxu0 %v3173_v38  ;;  %v3828_v38 = vld [vmem:[#allocation7 + $0x814] sm:$0xf]  ;;  %v3492_v7 = vld [vmem:[#allocation7 + $0x820] sm:$0xf]  ;;  %v3848_v8 = vld [vmem:[#allocation7 + $0x8ac] sm:$0xf0] }
  0x59   :  { %1930 = vmatpush.bf16.msra.mxu1 %v3177_v39  ;;  %v2453_v39 = vor.u32 %v3592_v26, %v2452_v25  ;;  %v2900_v25 = vld [vmem:[#allocation7 + $0x390] sm:$0xf]  ;;  %v3702_v26 = vld [vmem:[#allocation7 + $0x41c] sm:$0xf0]  ;;  %v3831_v17 = vld [vmem:[#allocation7 + $0x82c] sm:$0xf] }
  0x5a   :  { %1943 = vmatpush.bf16.msra.mxu2 %v3181_v40  ;;  %1956 = vmatpush.bf16.msra.mxu3 %v3185_v44  ;;  %v3478_v40 = vld [vmem:[#allocation7 + $0x8a0] sm:$0xf0]  ;;  %v2461_v44 = vor.u32 %v3593_v33, %v2460_v31  ;;  %v3703_v31 = vld [vmem:[#allocation7 + $0x424] sm:$0xf0]  ;;  %v2910_v33 = vld [vmem:[#allocation7 + $0x428] sm:$0xf0]  ;;  %v2901_v34 = vor.u32 %v3702_v26, %v2900_v25 }
  0x5b   :  { %v3481_v49 = vor.u32 %v3828_v38, %v3478_v40  ;;  %v2909_v36 = vor.u32 %v3703_v31, %v2908_v30  ;;  %v3666_v38 = vld [vmem:[#allocation7 + $0x2fc] sm:$0xf0]  ;;  %v3794_v25 = vld [vmem:[#allocation7 + $0x704] sm:$0xf]  ;;  %v3795_v30 = vld [vmem:[#allocation7 + $0x70c] sm:$0xf] }
  0x5c   :  { %1918 = vmatpush.bf16.msra.mxu0 %v3029_v50  ;;  %v3485_v50 = vor.u32 %v3847_v42, %v3484_v41  ;;  %v2758_v41 = vld [vmem:[#allocation7 + $0x300] sm:$0xf0]  ;;  %v2764_v42 = vld [vmem:[#allocation7 + $0x278] sm:$0xf]  ;;  %v2757_v46 = vor.u32 %v3666_v38, %v2756_v37  ;;  %v3358_v31 = vld [vmem:[#allocation7 + $0x798] sm:$0xf0] }
  0x5d   :  { %1931 = vmatpush.bf16.msra.mxu1 %v3033_v51  ;;  %v3332_v51 = vld [vmem:[#allocation7 + $0x6f0] sm:$0xf]  ;;  %v3758_v37 = vld [vmem:[#allocation7 + $0x5e4] sm:$0xf]  ;;  %v3361_v38 = vor.u32 %v3795_v30, %v3358_v31  ;;  %v2484_v31 = vld [vmem:[#allocation7 + $0x40] sm:$0xf] }
  0x5e   :  { %1944 = vmatpush.bf16.msra.mxu2 %v3037_v52  ;;  %1957 = vmatpush.bf16.msra.mxu3 %v3041_v56  ;;  %v3810_v52 = vld [vmem:[#allocation7 + $0x77c] sm:$0xf0]  ;;  %v3340_v56 = vld [vmem:[#allocation7 + $0x6f8] sm:$0xf]  ;;  %vm62_vm0 = vcmask 1041408   ;;  %s2406_s7 = sshll.u32 %s4094_s3, 4  ;;  %s2407_s7 = int_to_ptr.hbm [resolvable:$true] %s2406_s7 }
  0x5f   :  { %v3333_v60 = vor.u32 %v3810_v52, %v3332_v51  ;;  %v3612_v51 = vld [vmem:[#allocation7 + $0x154] sm:$0xf]  ;;  %s3969_s10 = smov [#allocation8]  }
  0x60   :  { %1919 = vmatpush.bf16.msra.mxu0 %v2885_v62  ;;  %v3341_v62 = vor.u32 %v3811_v57, %v3340_v56  ;;  %v3613_v56 = vld [vmem:[#allocation7 + $0x15c] sm:$0xf]  ;;  %v2622_v57 = vld [vmem:[#allocation7 + $0x1e8] sm:$0xf0] }
  0x61   :  { %1932 = vmatpush.bf16.msra.mxu1 %v2889_v63  ;;  %v3188_v63 = vld [vmem:[#allocation7 + $0x5d0] sm:$0xf] }
  0x62   :  { %1945 = vmatpush.bf16.msra.mxu2 %v2893_v0  ;;  %1958 = vmatpush.bf16.msra.mxu3 %v2897_v5  ;;  %v3774_v0 = vld [vmem:[#allocation7 + $0x65c] sm:$0xf0]  ;;  %v3196_v5 = vld [vmem:[#allocation7 + $0x5d8] sm:$0xf] }
  0x63   :  { %v3189_v10 = vor.u32 %v3774_v0, %v3188_v63  ;;  %v3576_v63 = vld [vmem:[#allocation7 + $0x34] sm:$0xf]  ;;  %v2470_v0 = vld [vmem:[#allocation7 + $0xc0] sm:$0xf0] }
  0x64   :  { %1920 = vmatpush.bf16.msra.mxu0 %v2741_v12  ;;  %v3197_v12 = vor.u32 %v3775_v6, %v3196_v5  ;;  %v3577_v5 = vld [vmem:[#allocation7 + $0x3c] sm:$0xf]  ;;  %v2478_v6 = vld [vmem:[#allocation7 + $0xc8] sm:$0xf0]  ;;  %v2473_v15 = vor.u32 %v3576_v63, %v2470_v0  ;;  %v2918_v63 = vld [vmem:[#allocation7 + $0x430] sm:$0xf0] }
  0x65   :  { %1933 = vmatpush.bf16.msra.mxu1 %v2745_v13  ;;  %v3044_v13 = vld [vmem:[#allocation7 + $0x4b0] sm:$0xf]  ;;  %v2924_v0 = vld [vmem:[#allocation7 + $0x3a8] sm:$0xf] }
  0x66   :  { %1946 = vmatpush.bf16.msra.mxu2 %v2749_v14  ;;  %1959 = vmatpush.bf16.msra.mxu3 %v2753_v18  ;;  %v3738_v14 = vld [vmem:[#allocation7 + $0x53c] sm:$0xf0]  ;;  %v3052_v18 = vld [vmem:[#allocation7 + $0x4b8] sm:$0xf] }
  0x67   :  { %v3045_v22 = vor.u32 %v3738_v14, %v3044_v13  ;;  %v3500_v13 = vld [vmem:[#allocation7 + $0x828] sm:$0xf]  ;;  %v3849_v14 = vld [vmem:[#allocation7 + $0x8b4] sm:$0xf0] }
  0x68   :  { %1921 = vmatpush.bf16.msra.mxu0 %v2597_v24  ;;  %v3053_v24 = vor.u32 %v3739_v19, %v3052_v18  ;;  %v3502_v18 = vld [vmem:[#allocation7 + $0x8b8] sm:$0xf0]  ;;  %v2481_v19 = vor.u32 %v3577_v5, %v2478_v6 }
  0x69   :  { %1934 = vmatpush.bf16.msra.mxu1 %v2601_v27  ;;  %v3684_v27 = vld [vmem:[#allocation7 + $0x394] sm:$0xf]  ;;  %v3505_v26 = vor.u32 %v3831_v17, %v3502_v18  ;;  %v2782_v17 = vld [vmem:[#allocation7 + $0x318] sm:$0xf0] }
  0x6a   :  { %1947 = vmatpush.bf16.msra.mxu2 %v2605_v28  ;;  %1960 = vmatpush.bf16.msra.mxu3 %v2609_v32  ;;  %v3057_v28 = vor.u32 %v3721_v20, %v3054_v21  ;;  %v3685_v32 = vld [vmem:[#allocation7 + $0x39c] sm:$0xf]  ;;  %v2905_v35 = vor.u32 %v3684_v27, %v2902_v29  ;;  %v3493_v20 = vor.u32 %v3848_v8, %v3492_v7  ;;  %v3350_v27 = vld [vmem:[#allocation7 + $0x790] sm:$0xf0]  ;;  %v3813_v29 = vld [vmem:[#allocation7 + $0x794] sm:$0xf0] }
  0x6b   :  { %v2913_v40 = vor.u32 %v3685_v32, %v2910_v33  ;;  %v3353_v33 = vor.u32 %v3794_v25, %v3350_v27  ;;  %v2772_v8 = vld [vmem:[#allocation7 + $0x280] sm:$0xf]  ;;  %v2630_v25 = vld [vmem:[#allocation7 + $0x1f0] sm:$0xf0]  ;;  %v3633_v27 = vld [vmem:[#allocation7 + $0x1f4] sm:$0xf0] }
  0x6c   :  { %1922 = vmatpush.bf16.msra.mxu0 %v2453_v39  ;;  %v3648_v39 = vld [vmem:[#allocation7 + $0x274] sm:$0xf] }
  0x6d   :  { %1935 = vmatpush.bf16.msra.mxu1 %v2457_v43  ;;  %v3667_v43 = vld [vmem:[#allocation7 + $0x304] sm:$0xf0] }
  0x6e   :  { %1948 = vmatpush.bf16.msra.mxu2 %v2461_v44  ;;  %1961 = vmatpush.bf16.msra.mxu3 %v2465_v47  ;;  %v3649_v44 = vld [vmem:[#allocation7 + $0x27c] sm:$0xf]  ;;  %v2761_v47 = vor.u32 %v3648_v39, %v2758_v41  ;;  %v3206_v39 = vld [vmem:[#allocation7 + $0x670] sm:$0xf0]  ;;  %v3777_v41 = vld [vmem:[#allocation7 + $0x674] sm:$0xf0] }
  0x6f   :  { %1923 = vmatmul.bf16.vlgmr.msra.gmra.mxu0 %v4003_v9  ;;  %v2769_v52 = vor.u32 %v3649_v44, %v2766_v45  ;;  %v3209_v45 = vor.u32 %v3758_v37, %v3206_v39  ;;  %v2492_v37 = vld [vmem:[#allocation7 + $0x48] sm:$0xf]  ;;  %v3597_v39 = vld [vmem:[#allocation7 + $0xd4] sm:$0xf0] }
  0x70   :  { %1967 = vmatpush.bf16.msrb.mxu0 %v3477_v48  ;;  %1936 = vmatmul.bf16.vlgmr.msra.gmra.mxu1 %v4003_v9  ;;  %v2765_v48 = vor.u32 %v3667_v43, %v2764_v42  ;;  %v3759_v42 = vld [vmem:[#allocation7 + $0x5ec] sm:$0xf]  ;;  %v3214_v43 = vld [vmem:[#allocation7 + $0x678] sm:$0xf0] }
  0x71   :  { %1980 = vmatpush.bf16.msrb.mxu1 %v3481_v49  ;;  %1949 = vmatmul.bf16.vlgmr.msra.gmra.mxu2 %v4003_v9  ;;  %v2612_v49 = vld [vmem:[#allocation7 + $0x150] sm:$0xf] }
  0x72   :  { %1993 = vmatpush.bf16.msrb.mxu2 %v3485_v50  ;;  %2006 = vmatpush.bf16.msrb.mxu3 %v3489_v54  ;;  %v3630_v50 = vld [vmem:[#allocation7 + $0x1dc] sm:$0xf0]  ;;  %v2620_v54 = vld [vmem:[#allocation7 + $0x158] sm:$0xf] }
  0x73   :  { %1962 = vmatmul.bf16.vlgmr.msra.gmra.mxu3 %v4003_v9  ;;  %v2613_v58 = vor.u32 %v3630_v50, %v2612_v49  ;;  %v3722_v49 = vld [vmem:[#allocation7 + $0x4c4] sm:$0xf]  ;;  %v3217_v50 = vor.u32 %v3759_v42, %v3214_v43  ;;  %v3508_v42 = vld [vmem:[#allocation7 + $0x830] sm:$0xf]  ;;  %v3850_v43 = vld [vmem:[#allocation7 + $0x8bc] sm:$0xf0] }
  0x74   :  { %1968 = vmatpush.bf16.msrb.mxu0 %v3333_v60  ;;  %v3594_v60 = vld [vmem:[#allocation7 + $0xbc] sm:$0xf0] }
  0x75   :  { %1981 = vmatpush.bf16.msrb.mxu1 %v3337_v61  ;;  %v2617_v61 = vor.u32 %v3612_v51, %v2614_v53  ;;  %v3062_v51 = vld [vmem:[#allocation7 + $0x550] sm:$0xf0]  ;;  %v3741_v53 = vld [vmem:[#allocation7 + $0x554] sm:$0xf0] }
  0x76   :  { %1994 = vmatpush.bf16.msrb.mxu2 %v3341_v62  ;;  %2007 = vmatpush.bf16.msrb.mxu3 %v3345_v3  ;;  %v2621_v62 = vor.u32 %v3631_v55, %v2620_v54  ;;  %v2625_v3 = vor.u32 %v3613_v56, %v2622_v57  ;;  %v3723_v54 = vld [vmem:[#allocation7 + $0x4cc] sm:$0xf]  ;;  %v3070_v55 = vld [vmem:[#allocation7 + $0x558] sm:$0xf0]  ;;  %v3065_v57 = vor.u32 %v3722_v49, %v3062_v51 }
  0x77   :  { %v3833_v51 = vld [vmem:[#allocation7 + $0x83c] sm:$0xf] }
  0x78   :  { %1969 = vmatpush.bf16.msrb.mxu0 %v3189_v10  ;;  %v3830_v10 = vld [vmem:[#allocation7 + $0x824] sm:$0xf] }
  0x79   :  { %1982 = vmatpush.bf16.msrb.mxu1 %v3193_v11  ;;  %v2469_v11 = vor.u32 %v3594_v60, %v2468_v59  ;;  %v2916_v59 = vld [vmem:[#allocation7 + $0x3a0] sm:$0xf]  ;;  %v3704_v60 = vld [vmem:[#allocation7 + $0x42c] sm:$0xf0] }
  0x7a   :  { %1995 = vmatpush.bf16.msrb.mxu2 %v3197_v12  ;;  %2008 = vmatpush.bf16.msrb.mxu3 %v3201_v16  ;;  %v3494_v12 = vld [vmem:[#allocation7 + $0x8b0] sm:$0xf0]  ;;  %v2477_v16 = vor.u32 %v3595_v4, %v2476_v1  ;;  %v3705_v1 = vld [vmem:[#allocation7 + $0x434] sm:$0xf0]  ;;  %v2926_v4 = vld [vmem:[#allocation7 + $0x438] sm:$0xf0]  ;;  %v2917_v5 = vor.u32 %v3704_v60, %v2916_v59 }
  0x7b   :  { %v3497_v21 = vor.u32 %v3830_v10, %v3494_v12  ;;  %v2925_v7 = vor.u32 %v3705_v1, %v2924_v0  ;;  %v3668_v10 = vld [vmem:[#allocation7 + $0x30c] sm:$0xf0]  ;;  %v3796_v59 = vld [vmem:[#allocation7 + $0x714] sm:$0xf]  ;;  %v3797_v0 = vld [vmem:[#allocation7 + $0x71c] sm:$0xf] }
  0x7c   :  { %1970 = vmatpush.bf16.msrb.mxu0 %v3045_v22  ;;  %v3501_v22 = vor.u32 %v3849_v14, %v3500_v13  ;;  %v2774_v13 = vld [vmem:[#allocation7 + $0x310] sm:$0xf0]  ;;  %v2780_v14 = vld [vmem:[#allocation7 + $0x288] sm:$0xf]  ;;  %v2773_v18 = vor.u32 %v3668_v10, %v2772_v8  ;;  %v3374_v1 = vld [vmem:[#allocation7 + $0x7a8] sm:$0xf0] }
  0x7d   :  { %1983 = vmatpush.bf16.msrb.mxu1 %v3049_v23  ;;  %v3348_v23 = vld [vmem:[#allocation7 + $0x700] sm:$0xf]  ;;  %v3760_v8 = vld [vmem:[#allocation7 + $0x5f4] sm:$0xf]  ;;  %v3377_v10 = vor.u32 %v3797_v0, %v3374_v1  ;;  %v2652_v0 = vld [vmem:[#allocation7 + $0x178] sm:$0xf] }
  0x7e   :  { %1996 = vmatpush.bf16.msrb.mxu2 %v3053_v24  ;;  %2009 = vmatpush.bf16.msrb.mxu3 %v3057_v28  ;;  %v3812_v24 = vld [vmem:[#allocation7 + $0x78c] sm:$0xf0]  ;;  %v3356_v28 = vld [vmem:[#allocation7 + $0x708] sm:$0xf] }
  0x7f   :  { %v3349_v32 = vor.u32 %v3812_v24, %v3348_v23  ;;  %v3614_v23 = vld [vmem:[#allocation7 + $0x164] sm:$0xf]  ;;  %v3635_v1 = vld [vmem:[#allocation7 + $0x204] sm:$0xf0] }
  0x80   :  { %1971 = vmatpush.bf16.msrb.mxu0 %v2901_v34  ;;  %v3357_v34 = vor.u32 %v3813_v29, %v3356_v28  ;;  %v3615_v28 = vld [vmem:[#allocation7 + $0x16c] sm:$0xf]  ;;  %v2638_v29 = vld [vmem:[#allocation7 + $0x1f8] sm:$0xf0] }
  0x81   :  { %1984 = vmatpush.bf16.msrb.mxu1 %v2905_v35  ;;  %v3204_v35 = vld [vmem:[#allocation7 + $0x5e0] sm:$0xf] }
  0x82   :  { %1997 = vmatpush.bf16.msrb.mxu2 %v2909_v36  ;;  %2010 = vmatpush.bf16.msrb.mxu3 %v2913_v40  ;;  %v3776_v36 = vld [vmem:[#allocation7 + $0x66c] sm:$0xf0]  ;;  %v3212_v40 = vld [vmem:[#allocation7 + $0x5e8] sm:$0xf] }
  0x83   :  { %v3205_v44 = vor.u32 %v3776_v36, %v3204_v35  ;;  %v3578_v35 = vld [vmem:[#allocation7 + $0x44] sm:$0xf]  ;;  %v2486_v36 = vld [vmem:[#allocation7 + $0xd0] sm:$0xf0] }
  0x84   :  { %1972 = vmatpush.bf16.msrb.mxu0 %v2757_v46  ;;  %v3213_v46 = vor.u32 %v3777_v41, %v3212_v40  ;;  %v3579_v40 = vld [vmem:[#allocation7 + $0x4c] sm:$0xf]  ;;  %v2494_v41 = vld [vmem:[#allocation7 + $0xd8] sm:$0xf0]  ;;  %v2489_v49 = vor.u32 %v3578_v35, %v2486_v36  ;;  %v2934_v35 = vld [vmem:[#allocation7 + $0x440] sm:$0xf0] }
  0x85   :  { %1985 = vmatpush.bf16.msrb.mxu1 %v2761_v47  ;;  %v3060_v47 = vld [vmem:[#allocation7 + $0x4c0] sm:$0xf]  ;;  %v2940_v36 = vld [vmem:[#allocation7 + $0x3b8] sm:$0xf] }
  0x86   :  { %1998 = vmatpush.bf16.msrb.mxu2 %v2765_v48  ;;  %2011 = vmatpush.bf16.msrb.mxu3 %v2769_v52  ;;  %v3740_v48 = vld [vmem:[#allocation7 + $0x54c] sm:$0xf0]  ;;  %v3068_v52 = vld [vmem:[#allocation7 + $0x4c8] sm:$0xf] }
  0x87   :  { %v3061_v56 = vor.u32 %v3740_v48, %v3060_v47  ;;  %v3516_v47 = vld [vmem:[#allocation7 + $0x838] sm:$0xf]  ;;  %v3851_v48 = vld [vmem:[#allocation7 + $0x8c4] sm:$0xf0] }
  0x88   :  { %1973 = vmatpush.bf16.msrb.mxu0 %v2613_v58  ;;  %v3069_v58 = vor.u32 %v3741_v53, %v3068_v52  ;;  %v3518_v52 = vld [vmem:[#allocation7 + $0x8c8] sm:$0xf0]  ;;  %v2497_v53 = vor.u32 %v3579_v40, %v2494_v41  ;;  %v2788_v41 = vld [vmem:[#allocation7 + $0x290] sm:$0xf] }
  0x89   :  { %1986 = vmatpush.bf16.msrb.mxu1 %v2617_v61  ;;  %v3686_v61 = vld [vmem:[#allocation7 + $0x3a4] sm:$0xf]  ;;  %v3521_v60 = vor.u32 %v3833_v51, %v3518_v52  ;;  %v3671_v51 = vld [vmem:[#allocation7 + $0x324] sm:$0xf0]  ;;  %v3653_v52 = vld [vmem:[#allocation7 + $0x29c] sm:$0xf] }
  0x8a   :  { %1999 = vmatpush.bf16.msrb.mxu2 %v2621_v62  ;;  %2012 = vmatpush.bf16.msrb.mxu3 %v2625_v3  ;;  %v3073_v62 = vor.u32 %v3723_v54, %v3070_v55  ;;  %v3687_v3 = vld [vmem:[#allocation7 + $0x3ac] sm:$0xf]  ;;  %v2921_v6 = vor.u32 %v3686_v61, %v2918_v63  ;;  %v3509_v54 = vor.u32 %v3850_v43, %v3508_v42  ;;  %v3366_v61 = vld [vmem:[#allocation7 + $0x7a0] sm:$0xf0]  ;;  %v3815_v63 = vld [vmem:[#allocation7 + $0x7a4] sm:$0xf0] }
  0x8b   :  { %v2929_v12 = vor.u32 %v3687_v3, %v2926_v4  ;;  %v3369_v4 = vor.u32 %v3796_v59, %v3366_v61  ;;  %v3670_v42 = vld [vmem:[#allocation7 + $0x31c] sm:$0xf0]  ;;  %v3652_v43 = vld [vmem:[#allocation7 + $0x294] sm:$0xf] }
  0x8c   :  { %1974 = vmatpush.bf16.msrb.mxu0 %v2469_v11  ;;  %v3650_v11 = vld [vmem:[#allocation7 + $0x284] sm:$0xf] }
  0x8d   :  { %1987 = vmatpush.bf16.msrb.mxu1 %v2473_v15  ;;  %v3669_v15 = vld [vmem:[#allocation7 + $0x314] sm:$0xf0] }
  0x8e   :  { %2000 = vmatpush.bf16.msrb.mxu2 %v2477_v16  ;;  %2013 = vmatpush.bf16.msrb.mxu3 %v2481_v19  ;;  %v3651_v16 = vld [vmem:[#allocation7 + $0x28c] sm:$0xf]  ;;  %v2777_v19 = vor.u32 %v3650_v11, %v2774_v13  ;;  %v3222_v11 = vld [vmem:[#allocation7 + $0x680] sm:$0xf0]  ;;  %v3779_v13 = vld [vmem:[#allocation7 + $0x684] sm:$0xf0] }
  0x8f   :  { %1975 = vmatmul.bf16.vlgmr.msrb.gmra.mxu0 %v4003_v9  ;;  %v2785_v24 = vor.u32 %v3651_v16, %v2782_v17  ;;  %v3225_v17 = vor.u32 %v3760_v8, %v3222_v11  ;;  %v2500_v8 = vld [vmem:[#allocation7 + $0x50] sm:$0xf] }
  0x90   :  { %2019 = vmatpush.bf16.msra.mxu0 %v3493_v20  ;;  %1988 = vmatmul.bf16.vlgmr.msrb.gmra.mxu1 %v4003_v9  ;;  %v2781_v20 = vor.u32 %v3669_v15, %v2780_v14  ;;  %v3761_v14 = vld [vmem:[#allocation7 + $0x5fc] sm:$0xf]  ;;  %v3230_v15 = vld [vmem:[#allocation7 + $0x688] sm:$0xf0] }
  0x91   :  { %2032 = vmatpush.bf16.msra.mxu1 %v3497_v21  ;;  %2001 = vmatmul.bf16.vlgmr.msrb.gmra.mxu2 %v4003_v9  ;;  %v2628_v21 = vld [vmem:[#allocation7 + $0x160] sm:$0xf] }
  0x92   :  { %2045 = vmatpush.bf16.msra.mxu2 %v3501_v22  ;;  %2058 = vmatpush.bf16.msra.mxu3 %v3505_v26  ;;  %v3632_v22 = vld [vmem:[#allocation7 + $0x1ec] sm:$0xf0]  ;;  %v2636_v26 = vld [vmem:[#allocation7 + $0x168] sm:$0xf] }
  0x93   :  { %2014 = vmatmul.bf16.vlgmr.msrb.gmra.mxu3 %v4003_v9  ;;  %v2629_v30 = vor.u32 %v3632_v22, %v2628_v21  ;;  %v3724_v21 = vld [vmem:[#allocation7 + $0x4d4] sm:$0xf]  ;;  %v3233_v22 = vor.u32 %v3761_v14, %v3230_v15 }
  0x94   :  { %2020 = vmatpush.bf16.msra.mxu0 %v3349_v32  ;;  %v3596_v32 = vld [vmem:[#allocation7 + $0xcc] sm:$0xf0]  ;;  %v3580_v15 = vld [vmem:[#allocation7 + $0x54] sm:$0xf] }
  0x95   :  { %2033 = vmatpush.bf16.msra.mxu1 %v3353_v33  ;;  %v2633_v33 = vor.u32 %v3614_v23, %v2630_v25  ;;  %v3078_v23 = vld [vmem:[#allocation7 + $0x560] sm:$0xf0]  ;;  %v3743_v25 = vld [vmem:[#allocation7 + $0x564] sm:$0xf0] }
  0x96   :  { %2046 = vmatpush.bf16.msra.mxu2 %v3357_v34  ;;  %2059 = vmatpush.bf16.msra.mxu3 %v3361_v38  ;;  %v2637_v34 = vor.u32 %v3633_v27, %v2636_v26  ;;  %v2641_v38 = vor.u32 %v3615_v28, %v2638_v29  ;;  %v3725_v26 = vld [vmem:[#allocation7 + $0x4dc] sm:$0xf]  ;;  %v3086_v27 = vld [vmem:[#allocation7 + $0x568] sm:$0xf0]  ;;  %v3081_v29 = vor.u32 %v3724_v21, %v3078_v23  ;;  %v2508_v21 = vld [vmem:[#allocation7 + $0x58] sm:$0xf] }
  0x98   :  { %2021 = vmatpush.bf16.msra.mxu0 %v3205_v44  ;;  %v3832_v44 = vld [vmem:[#allocation7 + $0x834] sm:$0xf] }
  0x99   :  { %2034 = vmatpush.bf16.msra.mxu1 %v3209_v45  ;;  %v2485_v45 = vor.u32 %v3596_v32, %v2484_v31  ;;  %v2932_v31 = vld [vmem:[#allocation7 + $0x3b0] sm:$0xf]  ;;  %v3706_v32 = vld [vmem:[#allocation7 + $0x43c] sm:$0xf0] }
  0x9a   :  { %2047 = vmatpush.bf16.msra.mxu2 %v3213_v46  ;;  %2060 = vmatpush.bf16.msra.mxu3 %v3217_v50  ;;  %v3510_v46 = vld [vmem:[#allocation7 + $0x8c0] sm:$0xf0]  ;;  %v2493_v50 = vor.u32 %v3597_v39, %v2492_v37  ;;  %v3707_v37 = vld [vmem:[#allocation7 + $0x444] sm:$0xf0]  ;;  %v2942_v39 = vld [vmem:[#allocation7 + $0x448] sm:$0xf0]  ;;  %v2933_v40 = vor.u32 %v3706_v32, %v2932_v31 }
  0x9b   :  { %v3513_v55 = vor.u32 %v3832_v44, %v3510_v46  ;;  %v2941_v46 = vor.u32 %v3707_v37, %v2940_v36  ;;  %v3834_v31 = vld [vmem:[#allocation7 + $0x844] sm:$0xf]  ;;  %v3853_v36 = vld [vmem:[#allocation7 + $0x8d4] sm:$0xf0] }
  0x9c   :  { %2022 = vmatpush.bf16.msra.mxu0 %v3061_v56  ;;  %v3517_v56 = vor.u32 %v3851_v48, %v3516_v47  ;;  %v2790_v47 = vld [vmem:[#allocation7 + $0x320] sm:$0xf0] }
  0x9d   :  { %2035 = vmatpush.bf16.msra.mxu1 %v3065_v57  ;;  %v3364_v57 = vld [vmem:[#allocation7 + $0x710] sm:$0xf]  ;;  %v2793_v61 = vor.u32 %v3652_v43, %v2790_v47  ;;  %v3380_v47 = vld [vmem:[#allocation7 + $0x720] sm:$0xf] }
  0x9e   :  { %2048 = vmatpush.bf16.msra.mxu2 %v3069_v58  ;;  %2061 = vmatpush.bf16.msra.mxu3 %v3073_v62  ;;  %v3814_v58 = vld [vmem:[#allocation7 + $0x79c] sm:$0xf0]  ;;  %v3372_v62 = vld [vmem:[#allocation7 + $0x718] sm:$0xf] }
  0x9f   :  { %v3365_v3 = vor.u32 %v3814_v58, %v3364_v57  ;;  %v2789_v57 = vor.u32 %v3670_v42, %v2788_v41  ;;  %v3616_v58 = vld [vmem:[#allocation7 + $0x174] sm:$0xf]  ;;  %v3534_v41 = vld [vmem:[#allocation7 + $0x8d8] sm:$0xf0] }
  0xa0   :  { %2023 = vmatpush.bf16.msra.mxu0 %v2917_v5  ;;  %v3373_v5 = vor.u32 %v3815_v63, %v3372_v62  ;;  %v2646_v63 = vld [vmem:[#allocation7 + $0x200] sm:$0xf0] }
  0xa1   :  { %2036 = vmatpush.bf16.msra.mxu1 %v2921_v6  ;;  %v3220_v6 = vld [vmem:[#allocation7 + $0x5f0] sm:$0xf] }
  0xa2   :  { %2049 = vmatpush.bf16.msra.mxu2 %v2925_v7  ;;  %2062 = vmatpush.bf16.msra.mxu3 %v2929_v12  ;;  %v3778_v7 = vld [vmem:[#allocation7 + $0x67c] sm:$0xf0]  ;;  %v3228_v12 = vld [vmem:[#allocation7 + $0x5f8] sm:$0xf] }
  0xa3   :  { %v3221_v16 = vor.u32 %v3778_v7, %v3220_v6 }
  0xa4   :  { %2024 = vmatpush.bf16.msra.mxu0 %v2773_v18  ;;  %v3229_v18 = vor.u32 %v3779_v13, %v3228_v12 }
  0xa5   :  { %2037 = vmatpush.bf16.msra.mxu1 %v2777_v19  ;;  %v3076_v19 = vld [vmem:[#allocation7 + $0x4d0] sm:$0xf] }
  0xa6   :  { %2050 = vmatpush.bf16.msra.mxu2 %v2781_v20  ;;  %2063 = vmatpush.bf16.msra.mxu3 %v2785_v24  ;;  %v3742_v20 = vld [vmem:[#allocation7 + $0x55c] sm:$0xf0]  ;;  %v3084_v24 = vld [vmem:[#allocation7 + $0x4d8] sm:$0xf] }
  0xa7   :  { %v3077_v28 = vor.u32 %v3742_v20, %v3076_v19  ;;  %v2649_v19 = vor.u32 %v3616_v58, %v2646_v63  ;;  %v2653_v20 = vor.u32 %v3635_v1, %v2652_v0  ;;  %v3238_v0 = vld [vmem:[#allocation7 + $0x690] sm:$0xf0]  ;;  %v3244_v1 = vld [vmem:[#allocation7 + $0x608] sm:$0xf] }
  0xa8   :  { %2025 = vmatpush.bf16.msra.mxu0 %v2629_v30  ;;  %v3085_v30 = vor.u32 %v3743_v25, %v3084_v24  ;;  %v3581_v25 = vld [vmem:[#allocation7 + $0x5c] sm:$0xf] }
  0xa9   :  { %2038 = vmatpush.bf16.msra.mxu1 %v2633_v33  ;;  %v3688_v33 = vld [vmem:[#allocation7 + $0x3b4] sm:$0xf] }
  0xaa   :  { %2051 = vmatpush.bf16.msra.mxu2 %v2637_v34  ;;  %2064 = vmatpush.bf16.msra.mxu3 %v2641_v38  ;;  %v3089_v34 = vor.u32 %v3725_v26, %v3086_v27  ;;  %v3689_v38 = vld [vmem:[#allocation7 + $0x3bc] sm:$0xf]  ;;  %v2510_v26 = vld [vmem:[#allocation7 + $0xe8] sm:$0xf0] }
  0xab   :  { %v2513_v42 = vor.u32 %v3581_v25, %v2510_v26  ;;  %v3690_v25 = vld [vmem:[#allocation7 + $0x3c4] sm:$0xf]  ;;  %v2950_v26 = vld [vmem:[#allocation7 + $0x450] sm:$0xf0] }
  0xac   :  { %2026 = vmatpush.bf16.msra.mxu0 %v2485_v45  ;;  %v1820_v44 = vpop.f32.mrf.mxu0  ;;  %v2937_v45 = vor.u32 %v3688_v33, %v2934_v35  ;;  %v3532_v35 = vld [vmem:[#allocation7 + $0x848] sm:$0xf] }
  0xad   :  { %2039 = vmatpush.bf16.msra.mxu1 %v2489_v49  ;;  %v2279_v48 = vand.u32 2147483647, %v1820_v44  ;;  %v2945_v49 = vor.u32 %v3689_v38, %v2942_v39 }
  0xae   :  { %2052 = vmatpush.bf16.msra.mxu2 %v2493_v50  ;;  %2065 = vmatpush.bf16.msra.mxu3 %v2497_v53  ;;  %v2796_v50 = vld [vmem:[#allocation7 + $0x298] sm:$0xf]  ;;  %v2798_v53 = vld [vmem:[#allocation7 + $0x328] sm:$0xf0] }
  0xaf   :  { %2027 = vmatmul.bf16.vlgmr.msra.gmra.mxu0 %v4003_v9  ;;  %v2315_v59 = vsel %vm62_vm0, %v2279_v48, 0.0  ;;  %v2797_v62 = vor.u32 %v3671_v51, %v2796_v50  ;;  %v3816_v48 = vld [vmem:[#allocation7 + $0x7ac] sm:$0xf0] }
  0xb0   :  { %2071 = vmatpush.bf16.msrb.mxu0 %v3509_v54  ;;  %2040 = vmatmul.bf16.vlgmr.msra.gmra.mxu1 %v4003_v9  ;;  %v2644_v54 = vld [vmem:[#allocation7 + $0x170] sm:$0xf] }
  0xb1   :  { %2084 = vmatpush.bf16.msrb.mxu1 %v3513_v55  ;;  %2053 = vmatmul.bf16.vlgmr.msra.gmra.mxu2 %v4003_v9  ;;  %v3634_v55 = vld [vmem:[#allocation7 + $0x1fc] sm:$0xf0] }
  0xb2   :  { %2097 = vmatpush.bf16.msrb.mxu2 %v3517_v56  ;;  %2110 = vmatpush.bf16.msrb.mxu3 %v3521_v60  ;;  %v1833_v56 = vpop.f32.mrf.mxu1  ;;  %v2645_v14 = vor.u32 %v3634_v55, %v2644_v54  ;;  %v3817_v54 = vld [vmem:[#allocation7 + $0x7b4] sm:$0xf0]  ;;  %v3799_v55 = vld [vmem:[#allocation7 + $0x72c] sm:$0xf] }
  0xb3   :  { %2066 = vmatmul.bf16.vlgmr.msra.gmra.mxu3 %v4003_v9  ;;  %v2280_v60 = vand.u32 2147483647, %v1833_v56  ;;  %v3390_v56 = vld [vmem:[#allocation7 + $0x7b8] sm:$0xf0] }
  0xb4   :  { %2072 = vmatpush.bf16.msrb.mxu0 %v3365_v3  ;;  %v2801_v3 = vor.u32 %v3653_v52, %v2798_v53  ;;  %v1846_v7 = vpop.f32.mrf.mxu2  ;;  %v3382_v52 = vld [vmem:[#allocation7 + $0x7b0] sm:$0xf0]  ;;  %v3388_v53 = vld [vmem:[#allocation7 + $0x728] sm:$0xf]  ;;  %v3393_v63 = vor.u32 %v3799_v55, %v3390_v56 }
  0xb5   :  { %2085 = vmatpush.bf16.msrb.mxu1 %v3369_v4  ;;  %v3617_v4 = vld [vmem:[#allocation7 + $0x17c] sm:$0xf]  ;;  %v2316_v6 = vsel %vm62_vm0, %v2280_v60, 0.0  ;;  %v2281_v12 = vand.u32 2147483647, %v1846_v7 }
  0xb6   :  { %2098 = vmatpush.bf16.msrb.mxu2 %v3373_v5  ;;  %2111 = vmatpush.bf16.msrb.mxu3 %v3377_v10  ;;  %v2654_v5 = vld [vmem:[#allocation7 + $0x208] sm:$0xf0]  ;;  %v3598_v10 = vld [vmem:[#allocation7 + $0xdc] sm:$0xf0]  ;;  %v2317_v11 = vadd.f32 %v2316_v6, %v2315_v59  ;;  %v1859_v13 = vpop.f32.mrf.mxu3  ;;  %v3389_v59 = vor.u32 %v3817_v54, %v3388_v53 }
  0xb7   :  { %v2318_v23 = vsel %vm62_vm0, %v2281_v12, 0.0  ;;  %v2657_v24 = vor.u32 %v3617_v4, %v2654_v5  ;;  %v2501_v33 = vor.u32 %v3598_v10, %v2500_v8  ;;  %v3236_v60 = vld [vmem:[#allocation7 + $0x600] sm:$0xf]  ;;  %v3763_v4 = vld [vmem:[#allocation7 + $0x60c] sm:$0xf] }
  0xb8   :  { %2073 = vmatpush.bf16.msrb.mxu0 %v3221_v16  ;;  %v2502_v16 = vld [vmem:[#allocation7 + $0xe0] sm:$0xf0]  ;;  %v2319_v27 = vadd.f32 %v2318_v23, %v2317_v11  ;;  %v3246_v5 = vld [vmem:[#allocation7 + $0x698] sm:$0xf0]  ;;  %v3092_v10 = vld [vmem:[#allocation7 + $0x4e0] sm:$0xf] }
  0xb9   :  { %2086 = vmatpush.bf16.msrb.mxu1 %v3225_v17  ;;  %v2282_v17 = vand.u32 2147483647, %v1859_v13  ;;  %v2505_v38 = vor.u32 %v3580_v15, %v2502_v16  ;;  %v3744_v11 = vld [vmem:[#allocation7 + $0x56c] sm:$0xf0]  ;;  %v3726_v12 = vld [vmem:[#allocation7 + $0x4e4] sm:$0xf]  ;;  %v3249_v13 = vor.u32 %v3763_v4, %v3246_v5 }
  0xba   :  { %2099 = vmatpush.bf16.msrb.mxu2 %v3229_v18  ;;  %2112 = vmatpush.bf16.msrb.mxu3 %v3233_v22  ;;  %v1822_v18 = vpop.f32.mrf.mxu0  ;;  %v3599_v22 = vld [vmem:[#allocation7 + $0xe4] sm:$0xf0]  ;;  %v1835_v32 = vpop.f32.mrf.mxu1  ;;  %v3745_v16 = vld [vmem:[#allocation7 + $0x574] sm:$0xf0]  ;;  %v3655_v53 = vld [vmem:[#allocation7 + $0x2ac] sm:$0xf] }
  0xbb   :  { %v2509_v39 = vor.u32 %v3599_v22, %v2508_v21  ;;  %v3100_v15 = vld [vmem:[#allocation7 + $0x4e8] sm:$0xf]  ;;  %v3102_v18 = vld [vmem:[#allocation7 + $0x578] sm:$0xf0]  ;;  %v3708_v21 = vld [vmem:[#allocation7 + $0x44c] sm:$0xf0] }
  0xbc   :  { %2074 = vmatpush.bf16.msrb.mxu0 %v3077_v28  ;;  %v2320_v28 = vsel %vm62_vm0, %v2282_v17, 0.0  ;;  %v1848_v44 = vpop.f32.mrf.mxu2  ;;  %v3727_v17 = vld [vmem:[#allocation7 + $0x4ec] sm:$0xf]  ;;  %v2662_v4 = vld [vmem:[#allocation7 + $0x210] sm:$0xf0] }
  0xbd   :  { %2087 = vmatpush.bf16.msrb.mxu1 %v3081_v29  ;;  %v3524_v29 = vld [vmem:[#allocation7 + $0x840] sm:$0xf]  ;;  %v4029_v37 = vadd.f32 %v2320_v28, %v2319_v27  ;;  %v3654_v44 = vld [vmem:[#allocation7 + $0x2a4] sm:$0xf]  ;;  %v2668_v5 = vld [vmem:[#allocation7 + $0x188] sm:$0xf] }
  0xbe   :  { %2100 = vmatpush.bf16.msrb.mxu2 %v3085_v30  ;;  %2113 = vmatpush.bf16.msrb.mxu3 %v3089_v34  ;;  %v3852_v30 = vld [vmem:[#allocation7 + $0x8cc] sm:$0xf0]  ;;  %v3526_v34 = vld [vmem:[#allocation7 + $0x8d0] sm:$0xf0]  ;;  %v1861_v50 = vpop.f32.mrf.mxu3 }
  0xbf   :  { %v3525_v43 = vor.u32 %v3852_v30, %v3524_v29  ;;  %v3105_v29 = vor.u32 %v3727_v17, %v3102_v18  ;;  %v2956_v30 = vld [vmem:[#allocation7 + $0x3c8] sm:$0xf]  ;;  %v3673_v50 = vld [vmem:[#allocation7 + $0x334] sm:$0xf0]  ;;  %v2518_v17 = vld [vmem:[#allocation7 + $0xf0] sm:$0xf0] }
  0xc0   :  { %2075 = vmatpush.bf16.msrb.mxu0 %v2933_v40  ;;  %v3835_v40 = vld [vmem:[#allocation7 + $0x84c] sm:$0xf]  ;;  %v2524_v18 = vld [vmem:[#allocation7 + $0x68] sm:$0xf] }
  0xc1   :  { %2088 = vmatpush.bf16.msrb.mxu1 %v2937_v45  ;;  %v3529_v45 = vor.u32 %v3834_v31, %v3526_v34  ;;  %v3537_v51 = vor.u32 %v3835_v40, %v3534_v41  ;;  %v3709_v31 = vld [vmem:[#allocation7 + $0x454] sm:$0xf0]  ;;  %v2958_v34 = vld [vmem:[#allocation7 + $0x458] sm:$0xf0]  ;;  %v2804_v40 = vld [vmem:[#allocation7 + $0x2a0] sm:$0xf]  ;;  %v2953_v41 = vor.u32 %v3690_v25, %v2950_v26 }
  0xc2   :  { %2101 = vmatpush.bf16.msrb.mxu2 %v2941_v46  ;;  %2114 = vmatpush.bf16.msrb.mxu3 %v2945_v49  ;;  %v3533_v46 = vor.u32 %v3853_v36, %v3532_v35  ;;  %v3798_v49 = vld [vmem:[#allocation7 + $0x724] sm:$0xf]  ;;  %v3540_v25 = vld [vmem:[#allocation7 + $0x850] sm:$0xf]  ;;  %v3854_v26 = vld [vmem:[#allocation7 + $0x8dc] sm:$0xf0] }
  0xc3   :  { %v3385_v58 = vor.u32 %v3798_v49, %v3382_v52  ;;  %v2812_v49 = vld [vmem:[#allocation7 + $0x2a8] sm:$0xf] }
  0xc4   :  { %2076 = vmatpush.bf16.msrb.mxu0 %v2789_v57  ;;  %v3381_v57 = vor.u32 %v3816_v48, %v3380_v47 }
  0xc5   :  { %2089 = vmatpush.bf16.msrb.mxu1 %v2793_v61  ;;  %v3780_v61 = vld [vmem:[#allocation7 + $0x68c] sm:$0xf0] }
  0xc6   :  { %2102 = vmatpush.bf16.msrb.mxu2 %v2797_v62  ;;  %2115 = vmatpush.bf16.msrb.mxu3 %v2801_v3  ;;  %v3762_v62 = vld [vmem:[#allocation7 + $0x604] sm:$0xf]  ;;  %v3781_v3 = vld [vmem:[#allocation7 + $0x694] sm:$0xf0]  ;;  %v3237_v6 = vor.u32 %v3780_v61, %v3236_v60  ;;  %v2813_v60 = vor.u32 %v3673_v50, %v2812_v49  ;;  %v3406_v49 = vld [vmem:[#allocation7 + $0x7c8] sm:$0xf0] }
  0xc7   :  { %v3241_v7 = vor.u32 %v3762_v62, %v3238_v0  ;;  %v3245_v8 = vor.u32 %v3781_v3, %v3244_v1  ;;  %v3618_v0 = vld [vmem:[#allocation7 + $0x184] sm:$0xf] }
  0xc8   :  { %2077 = vmatpush.bf16.msrb.mxu0 %v2645_v14  ;;  %v3094_v14 = vld [vmem:[#allocation7 + $0x570] sm:$0xf0] }
  0xc9   :  { %2090 = vmatpush.bf16.msrb.mxu1 %v2649_v19  ;;  %v3093_v19 = vor.u32 %v3744_v11, %v3092_v10  ;;  %v3097_v23 = vor.u32 %v3726_v12, %v3094_v14  ;;  %v2670_v10 = vld [vmem:[#allocation7 + $0x218] sm:$0xf0]  ;;  %v2516_v12 = vld [vmem:[#allocation7 + $0x60] sm:$0xf]  ;;  %v2665_v14 = vor.u32 %v3618_v0, %v2662_v4  ;;  %v3108_v0 = vld [vmem:[#allocation7 + $0x4f0] sm:$0xf] }
  0xca   :  { %2103 = vmatpush.bf16.msrb.mxu2 %v2653_v20  ;;  %2116 = vmatpush.bf16.msrb.mxu3 %v2657_v24  ;;  %v2948_v20 = vld [vmem:[#allocation7 + $0x3c0] sm:$0xf]  ;;  %v3101_v24 = vor.u32 %v3745_v16, %v3100_v15  ;;  %v3582_v16 = vld [vmem:[#allocation7 + $0x64] sm:$0xf] }
  0xcb   :  { %v2949_v36 = vor.u32 %v3708_v21, %v2948_v20  ;;  %v3601_v21 = vld [vmem:[#allocation7 + $0xf4] sm:$0xf0] }
  0xcc   :  { %2078 = vmatpush.bf16.msrb.mxu0 %v2501_v33  ;;  %v1872_v22 = vpop.f32.mrf.mxu0  ;;  %v3691_v33 = vld [vmem:[#allocation7 + $0x3cc] sm:$0xf] }
  0xcd   :  { %2091 = vmatpush.bf16.msrb.mxu1 %v2505_v38  ;;  %v2283_v27 = vand.u32 2147483647, %v1872_v22  ;;  %v1885_v28 = vpop.f32.mrf.mxu1  ;;  %v2961_v47 = vor.u32 %v3691_v33, %v2958_v34  ;;  %v3583_v22 = vld [vmem:[#allocation7 + $0x6c] sm:$0xf]  ;;  %v2525_v33 = vor.u32 %v3601_v21, %v2524_v18  ;;  %v3837_v34 = vld [vmem:[#allocation7 + $0x85c] sm:$0xf] }
  0xce   :  { %2104 = vmatpush.bf16.msrb.mxu2 %v2509_v39  ;;  %2117 = vmatpush.bf16.msrb.mxu3 %v2513_v42  ;;  %v2284_v32 = vand.u32 2147483647, %v1885_v28  ;;  %v2957_v42 = vor.u32 %v3709_v31, %v2956_v30  ;;  %v3548_v30 = vld [vmem:[#allocation7 + $0x858] sm:$0xf]  ;;  %v3855_v31 = vld [vmem:[#allocation7 + $0x8e4] sm:$0xf0] }
  0xcf   :  { %2079 = vmatmul.bf16.vlgmr.msrb.gmra.mxu0 %v4003_v9  ;;  %v2322_v35 = vsel %vm62_vm0, %v2283_v27, 0.0  ;;  %v3836_v27 = vld [vmem:[#allocation7 + $0x854] sm:$0xf] }
  0xd0   :  { %2123 = vmatpush.bf16.msra.mxu0 %v3525_v43  ;;  %2092 = vmatmul.bf16.vlgmr.msrb.gmra.mxu1 %v4003_v9  ;;  %v2323_v38 = vadd.f32 %v2322_v35, %v4029_v37  ;;  %v2324_v39 = vsel %vm62_vm0, %v2284_v32, 0.0  ;;  %v3672_v43 = vld [vmem:[#allocation7 + $0x32c] sm:$0xf0]  ;;  %v2814_v37 = vld [vmem:[#allocation7 + $0x338] sm:$0xf0]  ;;  %v2521_v32 = vor.u32 %v3582_v16, %v2518_v17 }
  0xd1   :  { %2136 = vmatpush.bf16.msra.mxu1 %v3529_v45  ;;  %2105 = vmatmul.bf16.vlgmr.msrb.gmra.mxu2 %v4003_v9  ;;  %v2806_v45 = vld [vmem:[#allocation7 + $0x330] sm:$0xf0]  ;;  %v2805_v55 = vor.u32 %v3672_v43, %v2804_v40  ;;  %v2817_v3 = vor.u32 %v3655_v53, %v2814_v37  ;;  %v3550_v35 = vld [vmem:[#allocation7 + $0x8e8] sm:$0xf0]  ;;  %v3549_v40 = vor.u32 %v3855_v31, %v3548_v30  ;;  %v3252_v53 = vld [vmem:[#allocation7 + $0x610] sm:$0xf] }
  0xd2   :  { %2149 = vmatpush.bf16.msra.mxu2 %v3533_v46  ;;  %2162 = vmatpush.bf16.msra.mxu3 %v3537_v51  ;;  %v2325_v48 = vadd.f32 %v2324_v39, %v2323_v38  ;;  %v3541_v38 = vor.u32 %v3854_v26, %v3540_v25  ;;  %v3800_v43 = vld [vmem:[#allocation7 + $0x734] sm:$0xf]  ;;  %v3782_v37 = vld [vmem:[#allocation7 + $0x69c] sm:$0xf0]  ;;  %v2964_v16 = vld [vmem:[#allocation7 + $0x3d0] sm:$0xf] }
  0xd3   :  { %2118 = vmatmul.bf16.vlgmr.msrb.gmra.mxu3 %v4003_v9  ;;  %v3710_v17 = vld [vmem:[#allocation7 + $0x45c] sm:$0xf0]  ;;  %v3692_v21 = vld [vmem:[#allocation7 + $0x3d4] sm:$0xf]  ;;  %v2972_v25 = vld [vmem:[#allocation7 + $0x3d8] sm:$0xf] }
  0xd4   :  { %2124 = vmatpush.bf16.msra.mxu0 %v3381_v57  ;;  %v1898_v46 = vpop.f32.mrf.mxu2  ;;  %v2660_v57 = vld [vmem:[#allocation7 + $0x180] sm:$0xf]  ;;  %v3711_v26 = vld [vmem:[#allocation7 + $0x464] sm:$0xf0]  ;;  %v2974_v30 = vld [vmem:[#allocation7 + $0x468] sm:$0xf0]  ;;  %v2965_v31 = vor.u32 %v3710_v17, %v2964_v16 }
  0xd5   :  { %2137 = vmatpush.bf16.msra.mxu1 %v3385_v58  ;;  %v2285_v51 = vand.u32 2147483647, %v1898_v46  ;;  %v1874_v58 = vpop.f32.mrf.mxu0  ;;  %v1887_v1 = vpop.f32.mrf.mxu1  ;;  %v3404_v46 = vld [vmem:[#allocation7 + $0x738] sm:$0xf]  ;;  %v3556_v17 = vld [vmem:[#allocation7 + $0x860] sm:$0xf] }
  0xd6   :  { %2150 = vmatpush.bf16.msra.mxu2 %v3389_v59  ;;  %2163 = vmatpush.bf16.msra.mxu3 %v3393_v63  ;;  %v1911_v52 = vpop.f32.mrf.mxu3  ;;  %v2809_v59 = vor.u32 %v3654_v44, %v2806_v45  ;;  %v3636_v63 = vld [vmem:[#allocation7 + $0x20c] sm:$0xf0]  ;;  %v3553_v44 = vor.u32 %v3837_v34, %v3550_v35  ;;  %v3398_v45 = vld [vmem:[#allocation7 + $0x7c0] sm:$0xf0]  ;;  %v3783_v58 = vld [vmem:[#allocation7 + $0x6a4] sm:$0xf0]  ;;  %v2973_v34 = vor.u32 %v3711_v26, %v2972_v25 }
  0xd7   :  { %v2286_v54 = vand.u32 2147483647, %v1911_v52  ;;  %v2326_v56 = vsel %vm62_vm0, %v2285_v51, 0.0  ;;  %v2661_v11 = vor.u32 %v3636_v63, %v2660_v57  ;;  %v3401_v51 = vor.u32 %v3800_v43, %v3398_v45  ;;  %v3260_v57 = vld [vmem:[#allocation7 + $0x618] sm:$0xf] }
  0xd8   :  { %2125 = vmatpush.bf16.msra.mxu0 %v3237_v6  ;;  %v2327_v61 = vadd.f32 %v2326_v56, %v2325_v48  ;;  %v3637_v6 = vld [vmem:[#allocation7 + $0x214] sm:$0xf0]  ;;  %v3801_v48 = vld [vmem:[#allocation7 + $0x73c] sm:$0xf]  ;;  %v3254_v56 = vld [vmem:[#allocation7 + $0x6a0] sm:$0xf0]  ;;  %v3261_v63 = vor.u32 %v3783_v58, %v3260_v57 }
  0xd9   :  { %2138 = vmatpush.bf16.msra.mxu1 %v3241_v7  ;;  %v2328_v62 = vsel %vm62_vm0, %v2286_v54, 0.0  ;;  %v2669_v15 = vor.u32 %v3637_v6, %v2668_v5  ;;  %v3764_v54 = vld [vmem:[#allocation7 + $0x614] sm:$0xf]  ;;  %v3746_v1 = vld [vmem:[#allocation7 + $0x57c] sm:$0xf0] }
  0xda   :  { %2151 = vmatpush.bf16.msra.mxu2 %v3245_v8  ;;  %2164 = vmatpush.bf16.msra.mxu3 %v3249_v13  ;;  %v4040_v7 = vadd.f32 %v2328_v62, %v2327_v61  ;;  %v3619_v8 = vld [vmem:[#allocation7 + $0x18c] sm:$0xf]  ;;  %v3600_v13 = vld [vmem:[#allocation7 + $0xec] sm:$0xf0]  ;;  %v3253_v61 = vor.u32 %v3782_v37, %v3252_v53  ;;  %v3257_v62 = vor.u32 %v3764_v54, %v3254_v56  ;;  %v3110_v5 = vld [vmem:[#allocation7 + $0x580] sm:$0xf0] }
  0xdb   :  { %v2673_v20 = vor.u32 %v3619_v8, %v2670_v10  ;;  %v2517_v28 = vor.u32 %v3600_v13, %v2516_v12  ;;  %v3116_v6 = vld [vmem:[#allocation7 + $0x4f8] sm:$0xf]  ;;  %v3747_v8 = vld [vmem:[#allocation7 + $0x584] sm:$0xf0]  ;;  %v3118_v12 = vld [vmem:[#allocation7 + $0x588] sm:$0xf0] }
  0xdc   :  { %2126 = vmatpush.bf16.msra.mxu0 %v3093_v19  ;;  %v1900_v19 = vpop.f32.mrf.mxu2  ;;  %v2820_v35 = vld [vmem:[#allocation7 + $0x2b0] sm:$0xf]  ;;  %v3657_v45 = vld [vmem:[#allocation7 + $0x2bc] sm:$0xf]  ;;  %v2678_v56 = vld [vmem:[#allocation7 + $0x220] sm:$0xf0] }
  0xdd   :  { %2139 = vmatpush.bf16.msra.mxu1 %v3097_v23  ;;  %v2526_v23 = vld [vmem:[#allocation7 + $0xf8] sm:$0xf0]  ;;  %v3117_v19 = vor.u32 %v3747_v8, %v3116_v6  ;;  %v3584_v8 = vld [vmem:[#allocation7 + $0x74] sm:$0xf] }
  0xde   :  { %2152 = vmatpush.bf16.msra.mxu2 %v3101_v24  ;;  %2165 = vmatpush.bf16.msra.mxu3 %v3105_v29  ;;  %v1913_v24 = vpop.f32.mrf.mxu3  ;;  %v3542_v29 = vld [vmem:[#allocation7 + $0x8e0] sm:$0xf0] }
  0xdf   :  { %v3545_v39 = vor.u32 %v3836_v27, %v3542_v29  ;;  %v3693_v29 = vld [vmem:[#allocation7 + $0x3dc] sm:$0xf] }
  0xe0   :  { %2127 = vmatpush.bf16.msra.mxu0 %v2949_v36  ;;  %v2529_v36 = vor.u32 %v3583_v22, %v2526_v23  ;;  %v2966_v22 = vld [vmem:[#allocation7 + $0x460] sm:$0xf0] }
  0xe1   :  { %2140 = vmatpush.bf16.msra.mxu1 %v2953_v41  ;;  %v3396_v41 = vld [vmem:[#allocation7 + $0x730] sm:$0xf] }
  0xe2   :  { %2153 = vmatpush.bf16.msra.mxu2 %v2957_v42  ;;  %2166 = vmatpush.bf16.msra.mxu3 %v2961_v47  ;;  %v3818_v42 = vld [vmem:[#allocation7 + $0x7bc] sm:$0xf0]  ;;  %v3819_v47 = vld [vmem:[#allocation7 + $0x7c4] sm:$0xf0] }
  0xe3   :  { %v3397_v50 = vor.u32 %v3818_v42, %v3396_v41  ;;  %v3405_v52 = vor.u32 %v3819_v47, %v3404_v46  ;;  %v2822_v41 = vld [vmem:[#allocation7 + $0x340] sm:$0xf0]  ;;  %v2828_v42 = vld [vmem:[#allocation7 + $0x2b8] sm:$0xf]  ;;  %v2830_v46 = vld [vmem:[#allocation7 + $0x348] sm:$0xf0] }
  0xe4   :  { %2128 = vmatpush.bf16.msra.mxu0 %v2805_v55  ;;  %v3409_v55 = vor.u32 %v3801_v48, %v3406_v49 }
  0xe5   :  { %2141 = vmatpush.bf16.msra.mxu1 %v2809_v59  ;;  %v3765_v59 = vld [vmem:[#allocation7 + $0x61c] sm:$0xf] }
  0xe6   :  { %2154 = vmatpush.bf16.msra.mxu2 %v2813_v60  ;;  %2167 = vmatpush.bf16.msra.mxu3 %v2817_v3  ;;  %v3262_v60 = vld [vmem:[#allocation7 + $0x6a8] sm:$0xf0]  ;;  %v3728_v3 = vld [vmem:[#allocation7 + $0x4f4] sm:$0xf] }
  0xe7   :  { %v3265_v4 = vor.u32 %v3765_v59, %v3262_v60  ;;  %v3113_v18 = vor.u32 %v3728_v3, %v3110_v5  ;;  %v2833_v59 = vor.u32 %v3657_v45, %v2830_v46  ;;  %v2684_v60 = vld [vmem:[#allocation7 + $0x198] sm:$0xf]  ;;  %v2532_v3 = vld [vmem:[#allocation7 + $0x70] sm:$0xf]  ;;  %v3268_v45 = vld [vmem:[#allocation7 + $0x620] sm:$0xf] }
  0xe8   :  { %2129 = vmatpush.bf16.msra.mxu0 %v2661_v11  ;;  %v3729_v11 = vld [vmem:[#allocation7 + $0x4fc] sm:$0xf]  ;;  %v3784_v46 = vld [vmem:[#allocation7 + $0x6ac] sm:$0xf0] }
  0xe9   :  { %2142 = vmatpush.bf16.msra.mxu1 %v2665_v14  ;;  %v3109_v14 = vor.u32 %v3746_v1, %v3108_v0  ;;  %v3121_v24 = vor.u32 %v3729_v11, %v3118_v12  ;;  %v2540_v11 = vld [vmem:[#allocation7 + $0x78] sm:$0xf] }
  0xea   :  { %2155 = vmatpush.bf16.msra.mxu2 %v2669_v15  ;;  %2168 = vmatpush.bf16.msra.mxu3 %v2673_v20 }
  0xec   :  { %2130 = vmatpush.bf16.msra.mxu0 %v2517_v28  ;;  %v1924_v10 = vpop.f32.mrf.mxu0 }
  0xed   :  { %2143 = vmatpush.bf16.msra.mxu1 %v2521_v32  ;;  %v2287_v13 = vand.u32 2147483647, %v1924_v10  ;;  %v1937_v15 = vpop.f32.mrf.mxu1  ;;  %v2534_v10 = vld [vmem:[#allocation7 + $0x100] sm:$0xf0] }
  0xee   :  { %2156 = vmatpush.bf16.msra.mxu2 %v2525_v33  ;;  %2169 = vmatpush.bf16.msra.mxu3 %v2529_v36  ;;  %v2288_v20 = vand.u32 2147483647, %v1937_v15  ;;  %v2969_v33 = vor.u32 %v3692_v21, %v2966_v22  ;;  %v3674_v36 = vld [vmem:[#allocation7 + $0x33c] sm:$0xf0]  ;;  %v2542_v15 = vld [vmem:[#allocation7 + $0x108] sm:$0xf0]  ;;  %v2537_v25 = vor.u32 %v3584_v8, %v2534_v10 }
  0xef   :  { %2131 = vmatmul.bf16.vlgmr.msra.gmra.mxu0 %v4003_v9  ;;  %v2330_v23 = vsel %vm62_vm0, %v2287_v13, 0.0  ;;  %v2821_v49 = vor.u32 %v3674_v36, %v2820_v35  ;;  %v3603_v13 = vld [vmem:[#allocation7 + $0x104] sm:$0xf0]  ;;  %v3558_v22 = vld [vmem:[#allocation7 + $0x8f0] sm:$0xf0] }
  0xf0   :  { %2175 = vmatpush.bf16.msrb.mxu0 %v3541_v38  ;;  %2144 = vmatmul.bf16.vlgmr.msra.gmra.mxu1 %v4003_v9  ;;  %v2331_v27 = vadd.f32 %v2330_v23, %v4040_v7  ;;  %v2332_v28 = vsel %vm62_vm0, %v2288_v20, 0.0  ;;  %v3656_v38 = vld [vmem:[#allocation7 + $0x2b4] sm:$0xf]  ;;  %v3675_v7 = vld [vmem:[#allocation7 + $0x344] sm:$0xf0]  ;;  %v2541_v26 = vor.u32 %v3603_v13, %v2540_v11 }
  0xf1   :  { %2188 = vmatpush.bf16.msrb.mxu1 %v3545_v39  ;;  %2157 = vmatmul.bf16.vlgmr.msra.gmra.mxu2 %v4003_v9  ;;  %v2977_v39 = vor.u32 %v3693_v29, %v2974_v30  ;;  %v2825_v37 = vor.u32 %v3656_v38, %v2822_v41  ;;  %v2829_v54 = vor.u32 %v3675_v7, %v2828_v42  ;;  %v3564_v23 = vld [vmem:[#allocation7 + $0x868] sm:$0xf]  ;;  %v3802_v35 = vld [vmem:[#allocation7 + $0x744] sm:$0xf]  ;;  %v3414_v38 = vld [vmem:[#allocation7 + $0x7d0] sm:$0xf0] }
  0xf2   :  { %2201 = vmatpush.bf16.msrb.mxu2 %v3549_v40  ;;  %2214 = vmatpush.bf16.msrb.mxu3 %v3553_v44  ;;  %v2333_v32 = vadd.f32 %v2332_v28, %v2331_v27  ;;  %v3839_v27 = vld [vmem:[#allocation7 + $0x86c] sm:$0xf]  ;;  %v3566_v28 = vld [vmem:[#allocation7 + $0x8f8] sm:$0xf0]  ;;  %v2980_v8 = vld [vmem:[#allocation7 + $0x3e0] sm:$0xf] }
  0xf3   :  { %2170 = vmatmul.bf16.vlgmr.msra.gmra.mxu3 %v4003_v9  ;;  %v3569_v36 = vor.u32 %v3839_v27, %v3566_v28  ;;  %v3803_v41 = vld [vmem:[#allocation7 + $0x74c] sm:$0xf]  ;;  %v3422_v42 = vld [vmem:[#allocation7 + $0x7d8] sm:$0xf0]  ;;  %v3712_v10 = vld [vmem:[#allocation7 + $0x46c] sm:$0xf0] }
  0xf4   :  { %2176 = vmatpush.bf16.msrb.mxu0 %v3397_v50  ;;  %v1950_v40 = vpop.f32.mrf.mxu2  ;;  %v1926_v47 = vpop.f32.mrf.mxu0  ;;  %v2676_v50 = vld [vmem:[#allocation7 + $0x190] sm:$0xf]  ;;  %v2836_v28 = vld [vmem:[#allocation7 + $0x2c0] sm:$0xf] }
  0xf5   :  { %2189 = vmatpush.bf16.msrb.mxu1 %v3401_v51  ;;  %v2289_v43 = vand.u32 2147483647, %v1950_v40  ;;  %v3638_v51 = vld [vmem:[#allocation7 + $0x21c] sm:$0xf0]  ;;  %v3821_v40 = vld [vmem:[#allocation7 + $0x7d4] sm:$0xf0] }
  0xf6   :  { %2202 = vmatpush.bf16.msrb.mxu2 %v3405_v52  ;;  %2215 = vmatpush.bf16.msrb.mxu3 %v3409_v55  ;;  %v1963_v44 = vpop.f32.mrf.mxu3  ;;  %v1939_v52 = vpop.f32.mrf.mxu1  ;;  %v3620_v55 = vld [vmem:[#allocation7 + $0x194] sm:$0xf]  ;;  %v2677_v1 = vor.u32 %v3638_v51, %v2676_v50  ;;  %v3766_v47 = vld [vmem:[#allocation7 + $0x624] sm:$0xf]  ;;  %v3276_v50 = vld [vmem:[#allocation7 + $0x628] sm:$0xf] }
  0xf7   :  { %v2290_v48 = vand.u32 2147483647, %v1963_v44  ;;  %v2334_v53 = vsel %vm62_vm0, %v2289_v43, 0.0  ;;  %v2681_v5 = vor.u32 %v3620_v55, %v2678_v56  ;;  %v3417_v43 = vor.u32 %v3802_v35, %v3414_v38  ;;  %v3785_v51 = vld [vmem:[#allocation7 + $0x6b4] sm:$0xf0] }
  0xf8   :  { %2177 = vmatpush.bf16.msrb.mxu0 %v3253_v61  ;;  %v2335_v57 = vadd.f32 %v2334_v53, %v2333_v32  ;;  %v3639_v61 = vld [vmem:[#allocation7 + $0x224] sm:$0xf0]  ;;  %v3767_v52 = vld [vmem:[#allocation7 + $0x62c] sm:$0xf]  ;;  %v3278_v53 = vld [vmem:[#allocation7 + $0x6b8] sm:$0xf0]  ;;  %v3277_v55 = vor.u32 %v3785_v51, %v3276_v50 }
  0xf9   :  { %2190 = vmatpush.bf16.msrb.mxu1 %v3257_v62  ;;  %v2336_v58 = vsel %vm62_vm0, %v2290_v48, 0.0  ;;  %v3621_v62 = vld [vmem:[#allocation7 + $0x19c] sm:$0xf]  ;;  %v2685_v6 = vor.u32 %v3639_v61, %v2684_v60  ;;  %v3425_v48 = vor.u32 %v3803_v41, %v3422_v42  ;;  %v3124_v56 = vld [vmem:[#allocation7 + $0x500] sm:$0xf] }
  0xfa   :  { %2203 = vmatpush.bf16.msrb.mxu2 %v3261_v63  ;;  %2216 = vmatpush.bf16.msrb.mxu3 %v3265_v4  ;;  %v2686_v63 = vld [vmem:[#allocation7 + $0x228] sm:$0xf0]  ;;  %v4051_v0 = vadd.f32 %v2336_v58, %v2335_v57  ;;  %v3602_v4 = vld [vmem:[#allocation7 + $0xfc] sm:$0xf0]  ;;  %v3748_v57 = vld [vmem:[#allocation7 + $0x58c] sm:$0xf0] }
  0xfb   :  { %v2689_v12 = vor.u32 %v3621_v62, %v2686_v63  ;;  %v2533_v21 = vor.u32 %v3602_v4, %v2532_v3  ;;  %v3730_v58 = vld [vmem:[#allocation7 + $0x504] sm:$0xf]  ;;  %v3126_v60 = vld [vmem:[#allocation7 + $0x590] sm:$0xf0]  ;;  %v3132_v61 = vld [vmem:[#allocation7 + $0x508] sm:$0xf] }
  0xfc   :  { %2178 = vmatpush.bf16.msrb.mxu0 %v3109_v14  ;;  %v3585_v14 = vld [vmem:[#allocation7 + $0x7c] sm:$0xf]  ;;  %v1952_v16 = vpop.f32.mrf.mxu2  ;;  %v3749_v62 = vld [vmem:[#allocation7 + $0x594] sm:$0xf0]  ;;  %v3129_v11 = vor.u32 %v3730_v58, %v3126_v60  ;;  %v3659_v38 = vld [vmem:[#allocation7 + $0x2cc] sm:$0xf] }
  0xfd   :  { %2191 = vmatpush.bf16.msrb.mxu1 %v3113_v18  ;;  %v3856_v18 = vld [vmem:[#allocation7 + $0x8ec] sm:$0xf0]  ;;  %v2545_v29 = vor.u32 %v3585_v14, %v2542_v15  ;;  %v3134_v3 = vld [vmem:[#allocation7 + $0x598] sm:$0xf0]  ;;  %v3694_v14 = vld [vmem:[#allocation7 + $0x3e4] sm:$0xf] }
  0xfe   :  { %2204 = vmatpush.bf16.msrb.mxu2 %v3117_v19  ;;  %2217 = vmatpush.bf16.msrb.mxu3 %v3121_v24  ;;  %v3838_v19 = vld [vmem:[#allocation7 + $0x864] sm:$0xf]  ;;  %v1965_v20 = vpop.f32.mrf.mxu3  ;;  %v3857_v24 = vld [vmem:[#allocation7 + $0x8f4] sm:$0xf0]  ;;  %v3557_v30 = vor.u32 %v3856_v18, %v3556_v17  ;;  %v2982_v15 = vld [vmem:[#allocation7 + $0x470] sm:$0xf0] }
  0xff   :  { %v3565_v32 = vor.u32 %v3857_v24, %v3564_v23  ;;  %v2988_v18 = vld [vmem:[#allocation7 + $0x3e8] sm:$0xf]  ;;  %v2990_v23 = vld [vmem:[#allocation7 + $0x478] sm:$0xf0]  ;;  %v2981_v24 = vor.u32 %v3712_v10, %v2980_v8  ;;  %v2548_v60 = vld [vmem:[#allocation7 + $0x80] sm:$0xf] }
 0x100   :  { %2179 = vmatpush.bf16.msrb.mxu0 %v2965_v31  ;;  %v3561_v31 = vor.u32 %v3838_v19, %v3558_v22  ;;  %v3713_v19 = vld [vmem:[#allocation7 + $0x474] sm:$0xf0]  ;;  %v3695_v22 = vld [vmem:[#allocation7 + $0x3ec] sm:$0xf]  ;;  %v2558_v8 = vld [vmem:[#allocation7 + $0x118] sm:$0xf0] }
 0x101   :  { %2192 = vmatpush.bf16.msrb.mxu1 %v2969_v33  ;;  %v3412_v33 = vld [vmem:[#allocation7 + $0x740] sm:$0xf]  ;;  %v2989_v27 = vor.u32 %v3713_v19, %v2988_v18 }
 0x102   :  { %2205 = vmatpush.bf16.msrb.mxu2 %v2973_v34  ;;  %2218 = vmatpush.bf16.msrb.mxu3 %v2977_v39  ;;  %v3820_v34 = vld [vmem:[#allocation7 + $0x7cc] sm:$0xf0]  ;;  %v3420_v39 = vld [vmem:[#allocation7 + $0x748] sm:$0xf] }
 0x103   :  { %v3413_v7 = vor.u32 %v3820_v34, %v3412_v33  ;;  %v3421_v44 = vor.u32 %v3821_v40, %v3420_v39  ;;  %v2838_v33 = vld [vmem:[#allocation7 + $0x350] sm:$0xf0]  ;;  %v2844_v34 = vld [vmem:[#allocation7 + $0x2c8] sm:$0xf]  ;;  %v2846_v39 = vld [vmem:[#allocation7 + $0x358] sm:$0xf0] }
 0x104   :  { %2180 = vmatpush.bf16.msrb.mxu0 %v2821_v49  ;;  %v3270_v49 = vld [vmem:[#allocation7 + $0x6b0] sm:$0xf0] }
 0x105   :  { %2193 = vmatpush.bf16.msrb.mxu1 %v2825_v37  ;;  %v3269_v37 = vor.u32 %v3784_v46, %v3268_v45 }
 0x106   :  { %2206 = vmatpush.bf16.msrb.mxu2 %v2829_v54  ;;  %2219 = vmatpush.bf16.msrb.mxu3 %v2833_v59  ;;  %v3273_v54 = vor.u32 %v3766_v47, %v3270_v49  ;;  %v3281_v59 = vor.u32 %v3767_v52, %v3278_v53  ;;  %v2694_v49 = vld [vmem:[#allocation7 + $0x230] sm:$0xf0]  ;;  %v2849_v52 = vor.u32 %v3659_v38, %v2846_v39  ;;  %v2700_v53 = vld [vmem:[#allocation7 + $0x1a8] sm:$0xf] }
 0x108   :  { %2181 = vmatpush.bf16.msrb.mxu0 %v2677_v1  ;;  %v3731_v1 = vld [vmem:[#allocation7 + $0x50c] sm:$0xf] }
 0x109   :  { %2194 = vmatpush.bf16.msrb.mxu1 %v2681_v5  ;;  %v3125_v5 = vor.u32 %v3748_v57, %v3124_v56  ;;  %v3137_v17 = vor.u32 %v3731_v1, %v3134_v3  ;;  %v2550_v1 = vld [vmem:[#allocation7 + $0x110] sm:$0xf0]  ;;  %v2556_v3 = vld [vmem:[#allocation7 + $0x88] sm:$0xf] }
 0x10a   :  { %2207 = vmatpush.bf16.msrb.mxu2 %v2685_v6  ;;  %2220 = vmatpush.bf16.msrb.mxu3 %v2689_v12  ;;  %v3133_v12 = vor.u32 %v3749_v62, %v3132_v61  ;;  %v3604_v61 = vld [vmem:[#allocation7 + $0x10c] sm:$0xf0]  ;;  %v3586_v62 = vld [vmem:[#allocation7 + $0x84] sm:$0xf] }
 0x10c   :  { %2182 = vmatpush.bf16.msrb.mxu0 %v2533_v21  ;;  %v1976_v63 = vpop.f32.mrf.mxu0 }
 0x10d   :  { %2195 = vmatpush.bf16.msrb.mxu1 %v2537_v25  ;;  %v2291_v4 = vand.u32 2147483647, %v1976_v63  ;;  %v1989_v6 = vpop.f32.mrf.mxu1 }
 0x10e   :  { %2208 = vmatpush.bf16.msrb.mxu2 %v2541_v26  ;;  %2221 = vmatpush.bf16.msrb.mxu3 %v2545_v29  ;;  %v2292_v13 = vand.u32 2147483647, %v1989_v6  ;;  %v2985_v26 = vor.u32 %v3694_v14, %v2982_v15  ;;  %v3676_v29 = vld [vmem:[#allocation7 + $0x34c] sm:$0xf0]  ;;  %v3587_v6 = vld [vmem:[#allocation7 + $0x8c] sm:$0xf] }
 0x10f   :  { %2183 = vmatmul.bf16.vlgmr.msrb.gmra.mxu0 %v4003_v9  ;;  %v2338_v16 = vsel %vm62_vm0, %v2291_v4, 0.0  ;;  %v2837_v42 = vor.u32 %v3676_v29, %v2836_v28  ;;  %v3605_v4 = vld [vmem:[#allocation7 + $0x114] sm:$0xf0]  ;;  %v2561_v14 = vor.u32 %v3587_v6, %v2558_v8 }
 0x110   :  { %2227 = vmatpush.bf16.msra.mxu0 %v3557_v30  ;;  %2196 = vmatmul.bf16.vlgmr.msrb.gmra.mxu1 %v4003_v9  ;;  %v2339_v20 = vadd.f32 %v2338_v16, %v4051_v0  ;;  %v2340_v21 = vsel %vm62_vm0, %v2292_v13, 0.0  ;;  %v3658_v30 = vld [vmem:[#allocation7 + $0x2c4] sm:$0xf]  ;;  %v3677_v0 = vld [vmem:[#allocation7 + $0x354] sm:$0xf0]  ;;  %v2557_v13 = vor.u32 %v3605_v4, %v2556_v3 }
 0x111   :  { %2240 = vmatpush.bf16.msra.mxu1 %v3561_v31  ;;  %2209 = vmatmul.bf16.vlgmr.msrb.gmra.mxu2 %v4003_v9  ;;  %v2993_v31 = vor.u32 %v3695_v22, %v2990_v23  ;;  %v2841_v46 = vor.u32 %v3658_v30, %v2838_v33  ;;  %v2845_v47 = vor.u32 %v3677_v0, %v2844_v34 }
 0x112   :  { %2253 = vmatpush.bf16.msra.mxu2 %v3565_v32  ;;  %2266 = vmatpush.bf16.msra.mxu3 %v3569_v36  ;;  %v2341_v25 = vadd.f32 %v2340_v21, %v2339_v20 }
 0x113   :  { %2222 = vmatmul.bf16.vlgmr.msrb.gmra.mxu3 %v4003_v9 }
 0x114   :  { %2228 = vmatpush.bf16.msra.mxu0 %v3413_v7  ;;  %v2002_v32 = vpop.f32.mrf.mxu2  ;;  %v1978_v40 = vpop.f32.mrf.mxu0  ;;  %v2692_v7 = vld [vmem:[#allocation7 + $0x1a0] sm:$0xf] }
 0x115   :  { %2241 = vmatpush.bf16.msra.mxu1 %v3417_v43  ;;  %v2293_v35 = vand.u32 2147483647, %v2002_v32  ;;  %v3640_v43 = vld [vmem:[#allocation7 + $0x22c] sm:$0xf0] }
 0x116   :  { %2254 = vmatpush.bf16.msra.mxu2 %v3421_v44  ;;  %2267 = vmatpush.bf16.msra.mxu3 %v3425_v48  ;;  %v2015_v36 = vpop.f32.mrf.mxu3  ;;  %v1991_v44 = vpop.f32.mrf.mxu1  ;;  %v3622_v48 = vld [vmem:[#allocation7 + $0x1a4] sm:$0xf]  ;;  %v2693_v57 = vor.u32 %v3640_v43, %v2692_v7 }
 0x117   :  { %v2294_v41 = vand.u32 2147483647, %v2015_v36  ;;  %v2342_v45 = vsel %vm62_vm0, %v2293_v35, 0.0  ;;  %v2697_v58 = vor.u32 %v3622_v48, %v2694_v49 }
 0x118   :  { %2229 = vmatpush.bf16.msra.mxu0 %v3269_v37  ;;  %v2343_v50 = vadd.f32 %v2342_v45, %v2341_v25  ;;  %v3641_v37 = vld [vmem:[#allocation7 + $0x234] sm:$0xf0] }
 0x119   :  { %2242 = vmatpush.bf16.msra.mxu1 %v3273_v54  ;;  %v2344_v51 = vsel %vm62_vm0, %v2294_v41, 0.0  ;;  %v3623_v54 = vld [vmem:[#allocation7 + $0x1ac] sm:$0xf] }
 0x11a   :  { %2255 = vmatpush.bf16.msra.mxu2 %v3277_v55  ;;  %2268 = vmatpush.bf16.msra.mxu3 %v3281_v59  ;;  %v2702_v55 = vld [vmem:[#allocation7 + $0x238] sm:$0xf0]  ;;  %v2345_v56 = vadd.f32 %v2344_v51, %v2343_v50  ;;  %v2701_v59 = vor.u32 %v3641_v37, %v2700_v53 }
 0x11b   :  { %v2705_v63 = vor.u32 %v3623_v54, %v2702_v55 }
 0x11c   :  { %2230 = vmatpush.bf16.msra.mxu0 %v3125_v5  ;;  %v2004_v5 = vpop.f32.mrf.mxu2 }
 0x11d   :  { %2243 = vmatpush.bf16.msra.mxu1 %v3129_v11  ;;  %v2549_v11 = vor.u32 %v3604_v61, %v2548_v60  ;;  %v61_v60 = vand.u32 2147483647, %v3999_v2 }
 0x11e   :  { %2256 = vmatpush.bf16.msra.mxu2 %v3133_v12  ;;  %2269 = vmatpush.bf16.msra.mxu3 %v3137_v17  ;;  %v2017_v10 = vpop.f32.mrf.mxu3  ;;  %v2553_v12 = vor.u32 %v3586_v62, %v2550_v1 }
 0x11f   :  { %v63_v61 = vsel %vm62_vm0, %v61_v60, 0.0 }
 0x120   :  { %2231 = vmatpush.bf16.msra.mxu0 %v2981_v24  ;;  %64 = vadd.xlane.f32.xlu0 %v63_v61 }
 0x121   :  { %2244 = vmatpush.bf16.msra.mxu1 %v2985_v26 }
 0x122   :  { %2257 = vmatpush.bf16.msra.mxu2 %v2989_v27  ;;  %2270 = vmatpush.bf16.msra.mxu3 %v2993_v31 }
 0x124   :  { %2232 = vmatpush.bf16.msra.mxu0 %v2837_v42 }
 0x125   :  { %2245 = vmatpush.bf16.msra.mxu1 %v2841_v46 }
 0x126   :  { %2258 = vmatpush.bf16.msra.mxu2 %v2845_v47  ;;  %2271 = vmatpush.bf16.msra.mxu3 %v2849_v52 }
 0x128   :  { %2233 = vmatpush.bf16.msra.mxu0 %v2693_v57 }
 0x129   :  { %2246 = vmatpush.bf16.msra.mxu1 %v2697_v58 }
 0x12a   :  { %2259 = vmatpush.bf16.msra.mxu2 %v2701_v59  ;;  %2272 = vmatpush.bf16.msra.mxu3 %v2705_v63 }
 0x12c   :  { %2234 = vmatpush.bf16.msra.mxu0 %v2549_v11  ;;  %v2028_v15 = vpop.f32.mrf.mxu0 }
 0x12d   :  { %2247 = vmatpush.bf16.msra.mxu1 %v2553_v12  ;;  %v2295_v16 = vand.u32 2147483647, %v2028_v15  ;;  %v2041_v17 = vpop.f32.mrf.mxu1 }
 0x12e   :  { %2260 = vmatpush.bf16.msra.mxu2 %v2557_v13  ;;  %2273 = vmatpush.bf16.msra.mxu3 %v2561_v14  ;;  %v2296_v18 = vand.u32 2147483647, %v2041_v17 }
 0x12f   :  { %2235 = vmatmul.bf16.vlgmr.msra.gmra.mxu0 %v4003_v9  ;;  %v2346_v19 = vsel %vm62_vm0, %v2295_v16, 0.0 }
 0x130   :  { %2248 = vmatmul.bf16.vlgmr.msra.gmra.mxu1 %v4003_v9  ;;  %v2347_v20 = vadd.f32 %v2346_v19, %v2345_v56  ;;  %v2348_v21 = vsel %vm62_vm0, %v2296_v18, 0.0 }
 0x131   :  { %2261 = vmatmul.bf16.vlgmr.msra.gmra.mxu2 %v4003_v9  ;;  %2274 = vmatmul.bf16.vlgmr.msra.gmra.mxu3 %v4003_v9 }
 0x132   :  { %v2349_v22 = vadd.f32 %v2348_v21, %v2347_v20 }
 0x134   :  { %v2054_v23 = vpop.f32.mrf.mxu2  ;;  %v2030_v26 = vpop.f32.mrf.mxu0 }
 0x135   :  { %v2297_v24 = vand.u32 2147483647, %v2054_v23  ;;  %v2043_v28 = vpop.f32.mrf.mxu1 }
 0x136   :  { %v2067_v25 = vpop.f32.mrf.mxu3 }
 0x137   :  { %v2298_v27 = vand.u32 2147483647, %v2067_v25  ;;  %v2350_v29 = vsel %vm62_vm0, %v2297_v24, 0.0 }
 0x138   :  { %v2351_v30 = vadd.f32 %v2350_v29, %v2349_v22 }
 0x139   :  { %v2352_v9 = vsel %vm62_vm0, %v2298_v27, 0.0 }
 0x13a   :  { %v2353_v31 = vadd.f32 %v2352_v9, %v2351_v30 }
 0x13c   :  { %v2056_v32 = vpop.f32.mrf.mxu2 }
 0x13e   :  { %v2069_v33 = vpop.f32.mrf.mxu3 }
 0x14c   :  { %v2080_v34 = vpop.f32.mrf.mxu0 }
 0x14d   :  { %v2299_v0 = vand.u32 2147483647, %v2080_v34  ;;  %v2093_v35 = vpop.f32.mrf.mxu1 }
 0x14e   :  { %v2300_v36 = vand.u32 2147483647, %v2093_v35 }
 0x14f   :  { %v2354_v38 = vsel %vm62_vm0, %v2299_v0, 0.0 }
 0x150   :  { %v2355_v39 = vadd.f32 %v2354_v38, %v2353_v31  ;;  %v2356_v40 = vsel %vm62_vm0, %v2300_v36, 0.0 }
 0x152   :  { %v2357_v41 = vadd.f32 %v2356_v40, %v2355_v39 }
 0x154   :  { %v2106_v42 = vpop.f32.mrf.mxu2  ;;  %v2082_v44 = vpop.f32.mrf.mxu0 }
 0x155   :  { %v2301_v7 = vand.u32 2147483647, %v2106_v42  ;;  %v2095_v46 = vpop.f32.mrf.mxu1 }
 0x156   :  { %v2119_v43 = vpop.f32.mrf.mxu3 }
 0x157   :  { %v2302_v45 = vand.u32 2147483647, %v2119_v43  ;;  %v2358_v47 = vsel %vm62_vm0, %v2301_v7, 0.0 }
 0x158   :  { %v2359_v48 = vadd.f32 %v2358_v47, %v2357_v41 }
 0x159   :  { %v2360_v49 = vsel %vm62_vm0, %v2302_v45, 0.0 }
 0x15a   :  { %v2361_v50 = vadd.f32 %v2360_v49, %v2359_v48 }
 0x15c   :  { %v2108_v51 = vpop.f32.mrf.mxu2 }
 0x15d   :  { %v3968_v51 = vmov 256.0  }
 0x15e   :  { %v2121_v52 = vpop.f32.mrf.mxu3  ;;  %3871 = vrcp.f32 %v3968_v51 }
 0x164   :  { %v3872_v52 = vpop.eup %3871 }
 0x165   :  { %vm78_vm1 = vweird.f32 %v3872_v52 }
 0x16c   :  { %v2132_v53 = vpop.f32.mrf.mxu0 }
 0x16d   :  { %v2145_v37 = vpop.f32.mrf.mxu1  ;;  %v2303_v1 = vand.u32 2147483647, %v2132_v53  ;;  %v74_v53 = vmul.f32 256.0, %v3872_v52 }
 0x16e   :  { %v2304_v4 = vand.u32 2147483647, %v2145_v37 }
 0x16f   :  { %v2362_v3 = vsel %vm62_vm0, %v2303_v1, 0.0  ;;  %v75_v37 = vsub.f32 1.0, %v74_v53 }
 0x170   :  { %v2363_v12 = vadd.f32 %v2362_v3, %v2361_v50  ;;  %v2364_v13 = vsel %vm62_vm0, %v2304_v4, 0.0 }
 0x172   :  { %v2365_v15 = vadd.f32 %v2364_v13, %v2363_v12 }
 0x174   :  { %v2158_v54 = vpop.f32.mrf.mxu2  ;;  %v2134_v56 = vpop.f32.mrf.mxu0 }
 0x175   :  { %v2147_v57 = vpop.f32.mrf.mxu1  ;;  %v2305_v10 = vand.u32 2147483647, %v2158_v54 }
 0x176   :  { %v2171_v55 = vpop.f32.mrf.mxu3  ;;  %v76_v57 = vmul.f32 %v3872_v52, %v75_v37 }
 0x177   :  { %v2366_v14 = vsel %vm62_vm0, %v2305_v10, 0.0  ;;  %v2306_v2 = vand.u32 2147483647, %v2171_v55 }
 0x178   :  { %v2367_v18 = vadd.f32 %v2366_v14, %v2365_v15  ;;  %v77_v60 = vadd.f32 %v3872_v52, %v76_v57 }
 0x179   :  { %v2368_v20 = vsel %vm62_vm0, %v2306_v2, 0.0 }
 0x17a   :  { %v2369_v23 = vadd.f32 %v2368_v20, %v2367_v18 }
 0x17c   :  { %v2160_v58 = vpop.f32.mrf.mxu2 }
 0x17e   :  { %v2173_v59 = vpop.f32.mrf.mxu3 }
 0x18c   :  { %v2184_v62 = vpop.f32.mrf.mxu0 }
 0x18d   :  { %v2197_v63 = vpop.f32.mrf.mxu1  ;;  %v2307_v16 = vand.u32 2147483647, %v2184_v62 }
 0x18e   :  { %v2308_v22 = vand.u32 2147483647, %v2197_v63  ;;  %v79_v63 = vsel %vm78_vm1, %v3872_v52, %v77_v60 }
 0x18f   :  { %v2370_v21 = vsel %vm62_vm0, %v2307_v16, 0.0 }
 0x190   :  { %v2371_v25 = vadd.f32 %v2370_v21, %v2369_v23  ;;  %v2372_v26 = vsel %vm62_vm0, %v2308_v22, 0.0 }
 0x192   :  { %v2373_v29 = vadd.f32 %v2372_v26, %v2371_v25 }
 0x193   :  { %v65_v54 = vpop.xlane.xlu0 %64 }
 0x194   :  { %v2210_v5 = vpop.f32.mrf.mxu2  ;;  %v2186_v8 = vpop.f32.mrf.mxu0  ;;  %v66_v55 = vrot.slane %v65_v54, 4 }
 0x195   :  { %v2199_v11 = vpop.f32.mrf.mxu1  ;;  %v2309_v24 = vand.u32 2147483647, %v2210_v5 }
 0x196   :  { %v2223_v6 = vpop.f32.mrf.mxu3  ;;  %v67_v56 = vadd.f32 %v66_v55, %v65_v54 }
 0x197   :  { %v2374_v27 = vsel %vm62_vm0, %v2309_v24, 0.0  ;;  %v2310_v28 = vand.u32 2147483647, %v2223_v6 }
 0x198   :  { %v2375_v30 = vadd.f32 %v2374_v27, %v2373_v29  ;;  %v68_v58 = vrot.slane %v67_v56, 2 }
 0x199   :  { %v2376_v9 = vsel %vm62_vm0, %v2310_v28, 0.0 }
 0x19a   :  { %v2377_v0 = vadd.f32 %v2376_v9, %v2375_v30  ;;  %v69_v59 = vadd.f32 %v68_v58, %v67_v56 }
 0x19c   :  { %v2212_v17 = vpop.f32.mrf.mxu2  ;;  %v70_v61 = vrot.slane %v69_v59, 1 }
 0x19e   :  { %v2225_v19 = vpop.f32.mrf.mxu3  ;;  %v71_v62 = vadd.f32 %v70_v61, %v69_v59 }
 0x1a0   :  { %3858 = vpush %v71_v62 }
 0x1a1   :  { %3860 = vpush %v79_v63 }
 0x1ac   :  { %v2236_v31 = vpop.f32.mrf.mxu0 }
 0x1ad   :  { %v2311_v32 = vand.u32 2147483647, %v2236_v31  ;;  %v2249_v33 = vpop.f32.mrf.mxu1 }
 0x1ae   :  { %v2312_v34 = vand.u32 2147483647, %v2249_v33 }
 0x1af   :  { %v2378_v35 = vsel %vm62_vm0, %v2311_v32, 0.0 }
 0x1b0   :  { %v2379_v36 = vadd.f32 %v2378_v35, %v2377_v0  ;;  %v2380_v38 = vsel %vm62_vm0, %v2312_v34, 0.0 }
 0x1b2   :  { %v2381_v7 = vadd.f32 %v2380_v38, %v2379_v36 }
 0x1b4   :  { %v2262_v39 = vpop.f32.mrf.mxu2  ;;  %v2275_v41 = vpop.f32.mrf.mxu3 }
 0x1b5   :  { %v2313_v40 = vand.u32 2147483647, %v2262_v39  ;;  %v2238_v42 = vpop.f32.mrf.mxu0  ;;  %v2314_v43 = vand.u32 2147483647, %v2275_v41  ;;  %v2251_v44 = vpop.f32.mrf.mxu1 }
 0x1b7   :  { %v2382_v45 = vsel %vm62_vm0, %v2313_v40, 0.0  ;;  %v2384_v47 = vsel %vm62_vm0, %v2314_v43, 0.0 }
 0x1b8   :  { %v2383_v46 = vadd.f32 %v2382_v45, %v2381_v7 }
 0x1ba   :  { %v2385_v48 = vadd.f32 %v2384_v47, %v2383_v46 }
 0x1bc   :  { %v2264_v49 = vpop.f32.mrf.mxu2  ;;  %2386 = vadd.xlane.f32.xlu0 %v2385_v48  ;;  %v2277_v50 = vpop.f32.mrf.mxu3 }
 0x1d1   :  { %s3859_s0 = spop %3858 }
 0x1d2   :  { %s3861_s2 = spop %3860 }
 0x1d3   :  { %s81_s28 = smul.f32 %s3861_s2, %s3859_s0 }
 0x1d5   :  { %s2396_s4 = smul.f32 0.5, %s81_s28 }
 0x22f   :  { %v2387_v1 = vpop.xlane.xlu0 %2386 }
 0x230   :  { %v2388_v3 = vrot.slane %v2387_v1, 4 }
 0x232   :  { %v2389_v4 = vadd.f32 %v2388_v3, %v2387_v1 }
 0x234   :  { %v2390_v5 = vrot.slane %v2389_v4, 2 }
 0x236   :  { %v2391_v6 = vadd.f32 %v2390_v5, %v2389_v4 }
 0x238   :  { %v2392_v8 = vrot.slane %v2391_v6, 1 }
 0x23a   :  { %v2393_v10 = vadd.f32 %v2392_v8, %v2391_v6 }
 0x23c   :  { %3862 = vpush %v2393_v10 }
 0x26d   :  { %s3863_s29 = spop %3862 }
 0x26e   :  { %s2395_s30 = smul.f32 0.000108506945, %s3863_s29 }
 0x270   :  { %s2397_s8 = smul.f32 0.5, %s2395_s30 }
 0x272   :  { %s2398_s9 = sadd.f32 %s2397_s8, %s2396_s4 }
 0x274   :  { %2400 = sst [smem:[#allocation8]] %s2398_s9 }
 0x275   :  { %2409 = dma.smem_to_hbm %s3969_s10, 16, %s2407_s7, [#allocation4]  }
 0x276   :  { %3961 = dma.done.wait [#allocation4], 16  }
 0x277   :  { %3962 = vsyncadd [#allocation4], 4294967280 }
 0x278   :  { %2414 = sfence }
 0x279   :  { %2415 = vsyncpa [#allocation3], 1 }
 0x27a   :  { %2416 = vsyncpa [#allocation6], 1 }
 0x27b   :  { %2417 = vsyncpa [#allocation4], 1 }

</bundles_post_ra>
